<compile_context>
chip_gen: v5e
topology: v5e:2x2
jax: 0.10.0
libtpu: 0.0.40
codegen_flags: <defaults>
</compile_context>

<pallas_src>
import numpy as np
import jax
import jax.numpy as jnp
from jax import lax
from jax.experimental import pallas as pl
from jax.experimental.pallas import tpu as pltpu


# ---------------------------------------------------------------------------
# Fused kernel: qkv -> masked MHA (head-batched) -> merge heads -> proj(+bias)
# ---------------------------------------------------------------------------
def _make_fused_kernel(num_heads, head_dim, dim, bn, scale, neg, ninf):
    H, hd, C, BN = num_heads, head_dim, dim, bn

    def kernel(mrow_ref, mcol_ref, brow_ref, bcol_ref, x_ref,
               wq_ref, wk_ref, wv_ref, wproj_ref, bproj_ref, o_ref):
        # x_ref: (BN, C)        masks / batch-ids: (1, BN) and (BN, 1) int32
        # wq/wk/wv_ref: (H, C, hd)   wproj_ref: (C, C)   bproj_ref: (1, C)
        # o_ref: (BN, C)
        x = x_ref[...]                                               # (BN, C)

        # ---- additive mask bias, built ONCE (replaces H per-head selects) ---
        valid = jnp.logical_and(mcol_ref[...] != 0, mrow_ref[...] != 0)  # (BN,BN)
        same_batch = bcol_ref[...] == brow_ref[...]                      # (BN,BN)
        bias = jnp.where(same_batch,
                         jnp.where(valid, 0.0, neg),   # reference masked_fill
                         ninf)                         # block cross-batch rows

        # ---- head-batched q/k/v projections (3 batched 3-D matmuls) ---------
        xb = jnp.broadcast_to(x, (H, BN, C))                         # (H,BN,C)
        q = jnp.einsum("hnc,hcd->hnd", xb, wq_ref[...],
                       preferred_element_type=jnp.float32)           # (H,BN,hd)
        k = jnp.einsum("hnc,hcd->hnd", xb, wk_ref[...],
                       preferred_element_type=jnp.float32)
        v = jnp.einsum("hnc,hcd->hnd", xb, wv_ref[...],
                       preferred_element_type=jnp.float32)

        # ---- one batched score matmul + ONE softmax over the whole slab -----
        s = jnp.einsum("hnd,hmd->hnm", q, k,
                       preferred_element_type=jnp.float32) * scale   # (H,BN,BN)
        s = s + bias[None, :, :]
        s = s - jnp.max(s, axis=-1, keepdims=True)
        e = jnp.exp(s)
        attn = e / jnp.sum(e, axis=-1, keepdims=True)  # exact divide (numerics)
        # attn_drop has p=0.0 -> identity

        # ---- attn @ v (batched), lane-dense head merge, output projection ---
        o = jnp.einsum("hnm,hmd->hnd", attn, v,
                       preferred_element_type=jnp.float32)            # (H,BN,hd)
        merged = jnp.concatenate([o[h] for h in range(H)], axis=-1)   # (BN, C)
        y = jnp.dot(merged, wproj_ref[...],
                    preferred_element_type=jnp.float32) + bproj_ref[...]
        # proj_drop has p=0.0 -> identity
        o_ref[...] = y.astype(o_ref.dtype)

    return kernel


# ---------------------------------------------------------------------------
# Module forward (single fused pallas_call, no grid)
# ---------------------------------------------------------------------------
def masked_heuristic_attention(x, mask, w_qkv, w_proj, b_proj, num_heads):
    """Equivalent of MaskedHeuristicAttention.forward (dropout p=0 -> identity)."""
    B, N, C = x.shape
    H = num_heads
    hd = C // H
    BN = B * N
    scale = float(hd) ** (-0.5)                       # Python floats: no captures
    neg = -float(np.finfo(np.float32).max)
    ninf = float("-inf")

    # One-time, tiny wrapper-side re-layouts so the kernel needs no transposes.
    # qkv column layout is [q | k | v], each block ordered (head, head_dim),
    # matching reshape(B,N,3,H,hd).permute(2,0,3,1,4).
    w_q = w_qkv[:, 0 * C:1 * C].reshape(C, H, hd).transpose(1, 0, 2)  # (H,C,hd)
    w_k = w_qkv[:, 1 * C:2 * C].reshape(C, H, hd).transpose(1, 0, 2)
    w_v = w_qkv[:, 2 * C:3 * C].reshape(C, H, hd).transpose(1, 0, 2)
    b_proj2 = b_proj.reshape(1, C)

    x2 = x.reshape(BN, C)                              # free row-major reshape
    mask_i32 = mask.astype(jnp.int32).reshape(BN)
    mask_row = mask_i32.reshape(1, BN)
    mask_col = mask_i32.reshape(BN, 1)
    bid = jnp.arange(BN, dtype=jnp.int32) // N         # batch id per packed row
    bid_row = bid.reshape(1, BN)
    bid_col = bid.reshape(BN, 1)

    kernel = _make_fused_kernel(H, hd, C, BN, scale, neg, ninf)

    out2 = pl.pallas_call(
        kernel,
        out_shape=jax.ShapeDtypeStruct((BN, C), x.dtype),
        # No grid / no BlockSpecs: single invocation, full arrays resident in
        # VMEM (total live VMEM < 1 MiB, far below even v7x's 64 MiB).
    )(mask_row, mask_col, bid_row, bid_col, x2, w_q, w_k, w_v, w_proj, b_proj2)
    return out2.reshape(B, N, C)


# ---------------------------------------------------------------------------
# Pure-JAX reference (for verification)
# ---------------------------------------------------------------------------
def reference(x, mask, w_qkv, w_proj, b_proj, num_heads):
    B, N, C = x.shape
    hd = C // num_heads
    scale = hd ** (-0.5)
    qkv = (x.reshape(B * N, C) @ w_qkv).reshape(B, N, 3, num_heads, hd)
    qkv = qkv.transpose(2, 0, 3, 1, 4)
    q, k, v = qkv[0], qkv[1], qkv[2]
    dots = jnp.einsum("bhnd,bhmd->bhnm", q, k) * scale
    pair = mask[:, None, :, None] & mask[:, None, None, :]
    dots = jnp.where(pair, dots, -jnp.finfo(jnp.float32).max)
    attn = jax.nn.softmax(dots, axis=-1)
    out = jnp.einsum("bhnm,bhmd->bhnd", attn, v)
    out = out.transpose(0, 2, 1, 3).reshape(B * N, C)
    return (out @ w_proj + b_proj).reshape(B, N, C)


if __name__ == "__main__":
    B, N, C, H = 2, 8, 32, 8  # dim=32, num_heads=8 -> head_dim=4

    key = jax.random.PRNGKey(0)
    k1, k2, k3, k4, k5 = jax.random.split(key, 5)
    w_qkv = jax.random.normal(k1, (C, 3 * C), jnp.float32) * 0.05
    w_proj = jax.random.normal(k2, (C, C), jnp.float32) * 0.05
    b_proj = jax.random.normal(k3, (C,), jnp.float32) * 0.05
    x = jax.random.normal(k4, (B, N, C), jnp.float32)
    mask = jax.random.uniform(k5, (B, N)) > 0.3  # bool mask, some positions masked

    out = masked_heuristic_attention(x, mask, w_qkv, w_proj, b_proj, H)
    out = jax.block_until_ready(out)

    ref = reference(x, mask, w_qkv, w_proj, b_proj, H)
    np.testing.assert_allclose(np.asarray(out), np.asarray(ref), rtol=1e-4, atol=1e-4)
    print("KERNEL_OK")
</pallas_src>

<mosaic_0001>
module attributes {stable_mosaic.version = 11 : i64} {
  func.func @kernel(%arg0: memref<1x16xi32, #tpu.memory_space<vmem>>, %arg1: memref<16x1xi32, #tpu.memory_space<vmem>>, %arg2: memref<1x16xi32, #tpu.memory_space<vmem>>, %arg3: memref<16x1xi32, #tpu.memory_space<vmem>>, %arg4: memref<16x32xf32, #tpu.memory_space<vmem>>, %arg5: memref<8x32x4xf32, #tpu.memory_space<vmem>>, %arg6: memref<8x32x4xf32, #tpu.memory_space<vmem>>, %arg7: memref<8x32x4xf32, #tpu.memory_space<vmem>>, %arg8: memref<32x32xf32, #tpu.memory_space<vmem>>, %arg9: memref<1x32xf32, #tpu.memory_space<vmem>>, %arg10: memref<16x32xf32, #tpu.memory_space<vmem>>) attributes {dimension_semantics = [], scalar_prefetch = 0 : i64, scratch_operands = 0 : i64, tpu.core_type = #tpu.core_type<tc>} {
    %c0 = arith.constant 0 : index
    %c0_0 = arith.constant 0 : index
    %0 = vector.load %arg4[%c0, %c0_0] : memref<16x32xf32, #tpu.memory_space<vmem>>, vector<16x32xf32>
    %c0_1 = arith.constant 0 : index
    %c0_2 = arith.constant 0 : index
    %1 = vector.load %arg1[%c0_1, %c0_2] : memref<16x1xi32, #tpu.memory_space<vmem>>, vector<16x1xi32>
    %c0_i32 = arith.constant 0 : i32
    %2 = vector.broadcast %c0_i32 : i32 to vector<16x1xi32>
    %3 = arith.cmpi ne, %1, %2 : vector<16x1xi32>
    %c0_3 = arith.constant 0 : index
    %c0_4 = arith.constant 0 : index
    %4 = vector.load %arg0[%c0_3, %c0_4] : memref<1x16xi32, #tpu.memory_space<vmem>>, vector<1x16xi32>
    %c0_i32_5 = arith.constant 0 : i32
    %5 = vector.broadcast %c0_i32_5 : i32 to vector<1x16xi32>
    %6 = arith.cmpi ne, %4, %5 : vector<1x16xi32>
    %7 = vector.broadcast %3 : vector<16x1xi1> to vector<16x16xi1>
    %8 = vector.broadcast %6 : vector<1x16xi1> to vector<16x16xi1>
    %9 = arith.andi %7, %8 : vector<16x16xi1>
    %c0_6 = arith.constant 0 : index
    %c0_7 = arith.constant 0 : index
    %10 = vector.load %arg3[%c0_6, %c0_7] : memref<16x1xi32, #tpu.memory_space<vmem>>, vector<16x1xi32>
    %c0_8 = arith.constant 0 : index
    %c0_9 = arith.constant 0 : index
    %11 = vector.load %arg2[%c0_8, %c0_9] : memref<1x16xi32, #tpu.memory_space<vmem>>, vector<1x16xi32>
    %12 = vector.broadcast %10 : vector<16x1xi32> to vector<16x16xi32>
    %13 = vector.broadcast %11 : vector<1x16xi32> to vector<16x16xi32>
    %14 = arith.cmpi eq, %12, %13 : vector<16x16xi32>
    %cst = arith.constant 0.000000e+00 : f32
    %cst_10 = arith.constant -3.40282347E+38 : f32
    %15 = vector.broadcast %cst : f32 to vector<16x16xf32>
    %16 = vector.broadcast %cst_10 : f32 to vector<16x16xf32>
    %17 = arith.select %9, %15, %16 : vector<16x16xi1>, vector<16x16xf32>
    %cst_11 = arith.constant 0xFF800000 : f32
    %18 = vector.broadcast %cst_11 : f32 to vector<16x16xf32>
    %19 = arith.select %14, %17, %18 : vector<16x16xi1>, vector<16x16xf32>
    %20 = vector.shape_cast %0 : vector<16x32xf32> to vector<1x16x32xf32>
    %21 = vector.broadcast %20 : vector<1x16x32xf32> to vector<8x16x32xf32>
    %c0_12 = arith.constant 0 : index
    %c0_13 = arith.constant 0 : index
    %c0_14 = arith.constant 0 : index
    %22 = vector.load %arg5[%c0_12, %c0_13, %c0_14] : memref<8x32x4xf32, #tpu.memory_space<vmem>>, vector<8x32x4xf32>
    "tpu.trace_start"() <{level = 10 : i32, message = "hnc,hcd->hnd"}> : () -> ()
    %cst_15 = arith.constant dense<0.000000e+00> : vector<8x16x4xf32>
    %23 = tpu.matmul %21, %22, %cst_15 {dimension_numbers = #tpu.dot_dimension_numbers<[2], [1], [1], [2], [0, 0, 0, 1, 1, 2], [0], [0]>} : vector<8x16x32xf32>, vector<8x32x4xf32>, vector<8x16x4xf32> -> vector<8x16x4xf32>
    "tpu.trace_stop"() : () -> ()
    %c0_16 = arith.constant 0 : index
    %c0_17 = arith.constant 0 : index
    %c0_18 = arith.constant 0 : index
    %24 = vector.load %arg6[%c0_16, %c0_17, %c0_18] : memref<8x32x4xf32, #tpu.memory_space<vmem>>, vector<8x32x4xf32>
    "tpu.trace_start"() <{level = 10 : i32, message = "hnc,hcd->hnd"}> : () -> ()
    %cst_19 = arith.constant dense<0.000000e+00> : vector<8x16x4xf32>
    %25 = tpu.matmul %21, %24, %cst_19 {dimension_numbers = #tpu.dot_dimension_numbers<[2], [1], [1], [2], [0, 0, 0, 1, 1, 2], [0], [0]>} : vector<8x16x32xf32>, vector<8x32x4xf32>, vector<8x16x4xf32> -> vector<8x16x4xf32>
    "tpu.trace_stop"() : () -> ()
    %c0_20 = arith.constant 0 : index
    %c0_21 = arith.constant 0 : index
    %c0_22 = arith.constant 0 : index
    %26 = vector.load %arg7[%c0_20, %c0_21, %c0_22] : memref<8x32x4xf32, #tpu.memory_space<vmem>>, vector<8x32x4xf32>
    "tpu.trace_start"() <{level = 10 : i32, message = "hnc,hcd->hnd"}> : () -> ()
    %cst_23 = arith.constant dense<0.000000e+00> : vector<8x16x4xf32>
    %27 = tpu.matmul %21, %26, %cst_23 {dimension_numbers = #tpu.dot_dimension_numbers<[2], [1], [1], [2], [0, 0, 0, 1, 1, 2], [0], [0]>} : vector<8x16x32xf32>, vector<8x32x4xf32>, vector<8x16x4xf32> -> vector<8x16x4xf32>
    "tpu.trace_stop"() : () -> ()
    "tpu.trace_start"() <{level = 10 : i32, message = "hnd,hmd->hnm"}> : () -> ()
    %cst_24 = arith.constant dense<0.000000e+00> : vector<8x16x16xf32>
    %28 = tpu.matmul %23, %25, %cst_24 {dimension_numbers = #tpu.dot_dimension_numbers<[2], [2], [1], [1], [0, 0, 0, 1, 1, 1], [0], [0]>} : vector<8x16x4xf32>, vector<8x16x4xf32>, vector<8x16x16xf32> -> vector<8x16x16xf32>
    "tpu.trace_stop"() : () -> ()
    %cst_25 = arith.constant 5.000000e-01 : f32
    %29 = vector.broadcast %cst_25 : f32 to vector<8x16x16xf32>
    %30 = arith.mulf %28, %29 : vector<8x16x16xf32>
    %31 = vector.shape_cast %19 : vector<16x16xf32> to vector<1x16x16xf32>
    %32 = vector.broadcast %31 : vector<1x16x16xf32> to vector<8x16x16xf32>
    %33 = arith.addf %30, %32 : vector<8x16x16xf32>
    %cst_26 = arith.constant dense<0xFF800000> : vector<8x16xf32>
    %34 = vector.multi_reduction <maximumf>, %33, %cst_26 [2] : vector<8x16x16xf32> to vector<8x16xf32>
    %35 = vector.shape_cast %34 : vector<8x16xf32> to vector<8x16x1xf32>
    %36 = vector.broadcast %35 : vector<8x16x1xf32> to vector<8x16x16xf32>
    %37 = arith.subf %33, %36 : vector<8x16x16xf32>
    %38 = math.exp %37 : vector<8x16x16xf32>
    %cst_27 = arith.constant dense<0.000000e+00> : vector<8x16xf32>
    %39 = vector.multi_reduction <add>, %38, %cst_27 [2] : vector<8x16x16xf32> to vector<8x16xf32>
    %40 = vector.shape_cast %39 : vector<8x16xf32> to vector<8x16x1xf32>
    %41 = vector.broadcast %40 : vector<8x16x1xf32> to vector<8x16x16xf32>
    %42 = arith.divf %38, %41 : vector<8x16x16xf32>
    "tpu.trace_start"() <{level = 10 : i32, message = "hnm,hmd->hnd"}> : () -> ()
    %cst_28 = arith.constant dense<0.000000e+00> : vector<8x16x4xf32>
    %43 = tpu.matmul %42, %27, %cst_28 {dimension_numbers = #tpu.dot_dimension_numbers<[2], [1], [1], [2], [0, 0, 0, 1, 1, 2], [0], [0]>} : vector<8x16x16xf32>, vector<8x16x4xf32>, vector<8x16x4xf32> -> vector<8x16x4xf32>
    "tpu.trace_stop"() : () -> ()
    %44 = vector.extract_strided_slice %43 {offsets = [0, 0, 0], sizes = [1, 16, 4], strides = [1, 1, 1]} : vector<8x16x4xf32> to vector<1x16x4xf32>
    %45 = vector.shape_cast %44 : vector<1x16x4xf32> to vector<16x4xf32>
    %46 = vector.extract_strided_slice %43 {offsets = [1, 0, 0], sizes = [1, 16, 4], strides = [1, 1, 1]} : vector<8x16x4xf32> to vector<1x16x4xf32>
    %47 = vector.shape_cast %46 : vector<1x16x4xf32> to vector<16x4xf32>
    %48 = vector.extract_strided_slice %43 {offsets = [2, 0, 0], sizes = [1, 16, 4], strides = [1, 1, 1]} : vector<8x16x4xf32> to vector<1x16x4xf32>
    %49 = vector.shape_cast %48 : vector<1x16x4xf32> to vector<16x4xf32>
    %50 = vector.extract_strided_slice %43 {offsets = [3, 0, 0], sizes = [1, 16, 4], strides = [1, 1, 1]} : vector<8x16x4xf32> to vector<1x16x4xf32>
    %51 = vector.shape_cast %50 : vector<1x16x4xf32> to vector<16x4xf32>
    %52 = vector.extract_strided_slice %43 {offsets = [4, 0, 0], sizes = [1, 16, 4], strides = [1, 1, 1]} : vector<8x16x4xf32> to vector<1x16x4xf32>
    %53 = vector.shape_cast %52 : vector<1x16x4xf32> to vector<16x4xf32>
    %54 = vector.extract_strided_slice %43 {offsets = [5, 0, 0], sizes = [1, 16, 4], strides = [1, 1, 1]} : vector<8x16x4xf32> to vector<1x16x4xf32>
    %55 = vector.shape_cast %54 : vector<1x16x4xf32> to vector<16x4xf32>
    %56 = vector.extract_strided_slice %43 {offsets = [6, 0, 0], sizes = [1, 16, 4], strides = [1, 1, 1]} : vector<8x16x4xf32> to vector<1x16x4xf32>
    %57 = vector.shape_cast %56 : vector<1x16x4xf32> to vector<16x4xf32>
    %58 = vector.extract_strided_slice %43 {offsets = [7, 0, 0], sizes = [1, 16, 4], strides = [1, 1, 1]} : vector<8x16x4xf32> to vector<1x16x4xf32>
    %59 = vector.shape_cast %58 : vector<1x16x4xf32> to vector<16x4xf32>
    %60 = tpu.concatenate %45, %47, %49, %51, %53, %55, %57, %59 in 1 : vector<16x4xf32>, vector<16x4xf32>, vector<16x4xf32>, vector<16x4xf32>, vector<16x4xf32>, vector<16x4xf32>, vector<16x4xf32>, vector<16x4xf32> -> vector<16x32xf32>
    %c0_29 = arith.constant 0 : index
    %c0_30 = arith.constant 0 : index
    %61 = vector.load %arg8[%c0_29, %c0_30] : memref<32x32xf32, #tpu.memory_space<vmem>>, vector<32x32xf32>
    %cst_31 = arith.constant dense<0.000000e+00> : vector<16x32xf32>
    %62 = tpu.matmul %60, %61, %cst_31 {dimension_numbers = #tpu.dot_dimension_numbers<[1], [0], [0], [1], [0, 0, 1, 1], [], []>} : vector<16x32xf32>, vector<32x32xf32>, vector<16x32xf32> -> vector<16x32xf32>
    %c0_32 = arith.constant 0 : index
    %c0_33 = arith.constant 0 : index
    %63 = vector.load %arg9[%c0_32, %c0_33] : memref<1x32xf32, #tpu.memory_space<vmem>>, vector<1x32xf32>
    %64 = vector.broadcast %63 : vector<1x32xf32> to vector<16x32xf32>
    %65 = arith.addf %62, %64 : vector<16x32xf32>
    %c0_34 = arith.constant 0 : index
    %c0_35 = arith.constant 0 : index
    %66 = vector.load %arg10[%c0_34, %c0_35] : memref<16x32xf32, #tpu.memory_space<vmem>>, vector<16x32xf32>
    tpu.vector_store %arg10[%c0_34, %c0_35], %65 {strides = array<i32>} : memref<16x32xf32, #tpu.memory_space<vmem>>, vector<16x32xf32>,
    return
  }
}

</mosaic_0001>

<bundles_post_ra>
// kernel: tpu_custom_call.1
= control target key start
LH: loop header
LB: loop body
LE: loop exit
PB: predicated region body
PF: predicated region fallthrough
CT: control target
= control target key end

     0   :  { %vm107_vm0 = vcmask 261120   ;;  %s2884_s0 = inlined_call_operand.vmem [shape: s32[1,16], index: 0, kind: input, shape index: {}]   ;;  %s2885_s1 = inlined_call_operand.vmem [shape: s32[16,1], index: 1, kind: input, shape index: {}]   ;;  %s2886_s2 = inlined_call_operand.vmem [shape: s32[1,16], index: 2, kind: input, shape index: {}]   ;;  %s2887_s3 = inlined_call_operand.vmem [shape: s32[16,1], index: 3, kind: input, shape index: {}]   ;;  %s2888_s4 = inlined_call_operand.vmem [shape: f32[16,32], index: 4, kind: input, shape index: {}]   ;;  %s2889_s5 = inlined_call_operand.vmem [shape: f32[8,32,4], index: 5, kind: input, shape index: {}]   ;;  %s2890_s6 = inlined_call_operand.vmem [shape: f32[8,32,4], index: 6, kind: input, shape index: {}]   ;;  %s2891_s7 = inlined_call_operand.vmem [shape: f32[8,32,4], index: 7, kind: input, shape index: {}]   ;;  %s2892_s8 = inlined_call_operand.vmem [shape: f32[32,32], index: 8, kind: input, shape index: {}]   ;;  %s2893_s9 = inlined_call_operand.vmem [shape: f32[1,32], index: 9, kind: input, shape index: {}]   ;;  %s2894_s10 = inlined_call_operand.hbm [shape: f32[16,32], index: 10, kind: output, shape index: {}]  }
   0x1   :  { %v78_v0 = vld [vmem:[%s2889_s5 + $0x18] sm:$0xff]  ;;  %v77_v3 = vld [vmem:[%s2889_s5 + $0x10] sm:$0xff]  ;;  %v76_v6 = vld [vmem:[%s2889_s5 + $0x8] sm:$0xff] }
   0x2   :  { %v86_v1 = vld [vmem:[%s2889_s5 + $0x58] sm:$0xff]  ;;  %126 = vmatpush.msra.mxu0 %v78_v0  ;;  %1890 = vmatpush.msra.mxu1 %v78_v0  ;;  %v85_v4 = vld [vmem:[%s2889_s5 + $0x50] sm:$0xff]  ;;  %v84_v7 = vld [vmem:[%s2889_s5 + $0x48] sm:$0xff] }
   0x3   :  { %v90_v2 = vld [vmem:[%s2889_s5 + $0x78] sm:$0xff]  ;;  %v89_v5 = vld [vmem:[%s2889_s5 + $0x70] sm:$0xff]  ;;  %172 = vmatpush.msra.mxu2 %v86_v1  ;;  %v88_v8 = vld [vmem:[%s2889_s5 + $0x68] sm:$0xff] }
   0x4   :  { %195 = vmatpush.msra.mxu3 %v90_v2  ;;  %127 = vmatpush.msra.mxu0 %v77_v3  ;;  %v75_v9 = vld [vmem:[%s2889_s5] sm:$0xff]  ;;  %v2109_v13 = vld [vmem:[%s2888_s4 + $0x8] sm:$0xff]  ;;  %v82_v14 = vld [vmem:[%s2889_s5 + $0x38] sm:$0xff] }
   0x5   :  { %1891 = vmatpush.msra.mxu1 %v77_v3  ;;  %173 = vmatpush.msra.mxu2 %v85_v4  ;;  %v83_v10 = vld [vmem:[%s2889_s5 + $0x40] sm:$0xff]  ;;  %v94_v15 = vld [vmem:[%s2889_s5 + $0x98] sm:$0xff]  ;;  %v81_v18 = vld [vmem:[%s2889_s5 + $0x30] sm:$0xff] }
   0x6   :  { %196 = vmatpush.msra.mxu3 %v89_v5  ;;  %128 = vmatpush.msra.mxu0 %v76_v6  ;;  %v87_v11 = vld [vmem:[%s2889_s5 + $0x60] sm:$0xff]  ;;  %v102_v16 = vld [vmem:[%s2889_s5 + $0xd8] sm:$0xff]  ;;  %v93_v19 = vld [vmem:[%s2889_s5 + $0x90] sm:$0xff] }
   0x7   :  { %1892 = vmatpush.msra.mxu1 %v76_v6  ;;  %174 = vmatpush.msra.mxu2 %v84_v7  ;;  %v2104_v12 = vld [vmem:[%s2888_s4] sm:$0xff]  ;;  %v106_v17 = vld [vmem:[%s2889_s5 + $0xf8] sm:$0xff]  ;;  %v101_v20 = vld [vmem:[%s2889_s5 + $0xd0] sm:$0xff] }
   0x8   :  { %197 = vmatpush.msra.mxu3 %v88_v8  ;;  %129 = vmatpush.msra.mxu0 %v75_v9  ;;  %v105_v21 = vld [vmem:[%s2889_s5 + $0xf0] sm:$0xff]  ;;  %v80_v22 = vld [vmem:[%s2889_s5 + $0x28] sm:$0xff]  ;;  %v79_v26 = vld [vmem:[%s2889_s5 + $0x20] sm:$0xff] }
   0x9   :  { %1893 = vmatpush.msra.mxu1 %v75_v9  ;;  %175 = vmatpush.msra.mxu2 %v83_v10  ;;  %v92_v23 = vld [vmem:[%s2889_s5 + $0x88] sm:$0xff]  ;;  %v91_v27 = vld [vmem:[%s2889_s5 + $0x80] sm:$0xff]  ;;  %v98_v30 = vld [vmem:[%s2889_s5 + $0xb8] sm:$0xff] }
   0xa   :  { %198 = vmatpush.msra.mxu3 %v87_v11  ;;  %1792 = vmatmul.msk.f32.vlgmr.msra.gmra.mxu0 %vm107_vm0, %v2104_v12  ;;  %v100_v24 = vld [vmem:[%s2889_s5 + $0xc8] sm:$0xff]  ;;  %v99_v28 = vld [vmem:[%s2889_s5 + $0xc0] sm:$0xff]  ;;  %v301_v31 = vld [vmem:[%s2890_s6 + $0x18] sm:$0xff] }
   0xb   :  { %1793 = vmatmul.msk.f32.vlgmr.msra.gmra.mxu1 %vm107_vm0, %v2109_v13  ;;  %1796 = vmatmul.msk.f32.vlgmr.msra.gmra.mxu2 %vm107_vm0, %v2104_v12  ;;  %v104_v25 = vld [vmem:[%s2889_s5 + $0xe8] sm:$0xff]  ;;  %v103_v29 = vld [vmem:[%s2889_s5 + $0xe0] sm:$0xff] }
   0xc   :  { %1798 = vmatmul.msk.f32.vlgmr.msra.gmra.mxu3 %vm107_vm0, %v2104_v12  ;;  %149 = vmatpush.msrb.mxu1 %v82_v14 }
   0xd   :  { %218 = vmatpush.msrb.mxu0 %v94_v15  ;;  %264 = vmatpush.msrb.mxu2 %v102_v16 }
   0xe   :  { %287 = vmatpush.msrb.mxu3 %v106_v17  ;;  %150 = vmatpush.msrb.mxu1 %v81_v18 }
   0xf   :  { %219 = vmatpush.msrb.mxu0 %v93_v19  ;;  %265 = vmatpush.msrb.mxu2 %v101_v20 }
  0x10   :  { %288 = vmatpush.msrb.mxu3 %v105_v21  ;;  %151 = vmatpush.msrb.mxu1 %v80_v22 }
  0x11   :  { %220 = vmatpush.msrb.mxu0 %v92_v23  ;;  %266 = vmatpush.msrb.mxu2 %v100_v24 }
  0x12   :  { %289 = vmatpush.msrb.mxu3 %v104_v25  ;;  %152 = vmatpush.msrb.mxu1 %v79_v26 }
  0x13   :  { %221 = vmatpush.msrb.mxu0 %v91_v27  ;;  %1794 = vmatmul.msk.f32.vlgmr.msrb.gmra.mxu1 %vm107_vm0, %v2104_v12 }
  0x14   :  { %1797 = vmatmul.msk.f32.gmra.mxu2 %vm107_vm0, %v2109_v13 }
  0x15   :  { %15 = vsyncpa [#allocation3], 0  ;;  %1799 = vmatmul.msk.f32.gmra.mxu3 %vm107_vm0, %v2109_v13  ;;  %1800 = vmatmul.msk.f32.vlgmr.msrb.gmra.mxu0 %vm107_vm0, %v2104_v12  ;;  %v309_v32 = vld [vmem:[%s2890_s6 + $0x58] sm:$0xff]  ;;  %v97_v34 = vld [vmem:[%s2889_s5 + $0xb0] sm:$0xff]  ;;  %vm730_vm3 = vcmask 31744   ;;  %vm1043_vm10 = vcmask 130048  }
  0x16   :  { %v313_v33 = vld [vmem:[%s2890_s6 + $0x78] sm:$0xff]  ;;  %267 = vmatpush.msrb.mxu2 %v99_v28  ;;  %290 = vmatpush.msrb.mxu3 %v103_v29  ;;  %v300_v35 = vld [vmem:[%s2890_s6 + $0x10] sm:$0xff]  ;;  %v96_v38 = vld [vmem:[%s2889_s5 + $0xa8] sm:$0xff]  ;;  %s2003_s20 = smov 16   ;;  %s2004_s21 = smov 12  }
  0x17   :  { %241 = vmatpush.msra.mxu1 %v98_v30  ;;  %342 = vmatpush.msra.mxu0 %v301_v31  ;;  %v308_v36 = vld [vmem:[%s2890_s6 + $0x50] sm:$0xff]  ;;  %v299_v39 = vld [vmem:[%s2890_s6 + $0x8] sm:$0xff]  ;;  %v95_v40 = vld [vmem:[%s2889_s5 + $0xa0] sm:$0xff]  ;;  %s2005_s22 = smov 24   ;;  %s2006_s23 = smov 20  }
  0x18   :  { %v312_v37 = vld [vmem:[%s2890_s6 + $0x70] sm:$0xff]  ;;  %388 = vmatpush.msra.mxu2 %v309_v32  ;;  %411 = vmatpush.msra.mxu3 %v313_v33  ;;  %v298_v41 = vld [vmem:[%s2890_s6] sm:$0xff]  ;;  %v307_v42 = vld [vmem:[%s2890_s6 + $0x48] sm:$0xff]  ;;  %s2007_s24 = smov 28   ;;  %s2008_s15 = smov [#allocation2]  }
  0x19   :  { %242 = vmatpush.msra.mxu1 %v97_v34  ;;  %343 = vmatpush.msra.mxu0 %v300_v35  ;;  %v311_v43 = vld [vmem:[%s2890_s6 + $0x68] sm:$0xff]  ;;  %v305_v44 = vld [vmem:[%s2890_s6 + $0x38] sm:$0xff]  ;;  %v306_v46 = vld [vmem:[%s2890_s6 + $0x40] sm:$0xff]  ;;  %s1778_s16 = sshll.u32 %s2008_s15, 4  ;;  %s2009_s17 = smov 128   ;;  %s1779_s16 = int_to_ptr.vmem [resolvable:$true] %s1778_s16 }
  0x1a   :  { %389 = vmatpush.msra.mxu2 %v308_v36  ;;  %412 = vmatpush.msra.mxu3 %v312_v37  ;;  %v317_v45 = vld [vmem:[%s2890_s6 + $0x98] sm:$0xff]  ;;  %v310_v47 = vld [vmem:[%s2890_s6 + $0x60] sm:$0xff]  ;;  %v304_v48 = vld [vmem:[%s2890_s6 + $0x30] sm:$0xff] }
  0x1b   :  { %243 = vmatpush.msra.mxu1 %v96_v38  ;;  %344 = vmatpush.msra.mxu0 %v299_v39  ;;  %v316_v49 = vld [vmem:[%s2890_s6 + $0x90] sm:$0xff]  ;;  %v325_v50 = vld [vmem:[%s2890_s6 + $0xd8] sm:$0xff]  ;;  %v303_v52 = vld [vmem:[%s2890_s6 + $0x28] sm:$0xff] }
  0x1c   :  { %1795 = vmatmul.msk.f32.gmra.mxu1 %vm107_vm0, %v2109_v13  ;;  %1804 = vmatmul.msk.f32.vlgmr.msrb.gmra.mxu2 %vm107_vm0, %v2104_v12  ;;  %v329_v51 = vld [vmem:[%s2890_s6 + $0xf8] sm:$0xff]  ;;  %v315_v53 = vld [vmem:[%s2890_s6 + $0x88] sm:$0xff]  ;;  %v324_v54 = vld [vmem:[%s2890_s6 + $0xd0] sm:$0xff] }
  0x1d   :  { %1801 = vmatmul.msk.f32.gmra.mxu0 %vm107_vm0, %v2109_v13  ;;  %1806 = vmatmul.msk.f32.vlgmr.msrb.gmra.mxu3 %vm107_vm0, %v2104_v12  ;;  %v328_v55 = vld [vmem:[%s2890_s6 + $0xf0] sm:$0xff]  ;;  %v302_v56 = vld [vmem:[%s2890_s6 + $0x20] sm:$0xff]  ;;  %v323_v58 = vld [vmem:[%s2890_s6 + $0xc8] sm:$0xff] }
  0x1e   :  { %244 = vmatpush.msra.mxu1 %v95_v40  ;;  %345 = vmatpush.msra.mxu0 %v298_v41  ;;  %v314_v57 = vld [vmem:[%s2890_s6 + $0x80] sm:$0xff]  ;;  %v327_v59 = vld [vmem:[%s2890_s6 + $0xe8] sm:$0xff]  ;;  %v321_v60 = vld [vmem:[%s2890_s6 + $0xb8] sm:$0xff] }
  0x1f   :  { %390 = vmatpush.msra.mxu2 %v307_v42  ;;  %413 = vmatpush.msra.mxu3 %v311_v43  ;;  %v322_v61 = vld [vmem:[%s2890_s6 + $0xc0] sm:$0xff]  ;;  %v320_v63 = vld [vmem:[%s2890_s6 + $0xb0] sm:$0xff]  ;;  %v319_v0 = vld [vmem:[%s2890_s6 + $0xa8] sm:$0xff]  ;;  %v1999_v43 = vmov 0  }
  0x20   :  { %365 = vmatpush.msrb.mxu1 %v305_v44  ;;  %434 = vmatpush.msrb.mxu0 %v317_v45  ;;  %v326_v62 = vld [vmem:[%s2890_s6 + $0xe0] sm:$0xff]  ;;  %v517_v2 = vld [vmem:[%s2891_s7 + $0x18] sm:$0xff]  ;;  %v516_v3 = vld [vmem:[%s2891_s7 + $0x10] sm:$0xff] }
  0x21   :  { %391 = vmatpush.msra.mxu2 %v306_v46  ;;  %414 = vmatpush.msra.mxu3 %v310_v47  ;;  %v318_v1 = vld [vmem:[%s2890_s6 + $0xa0] sm:$0xff]  ;;  %v515_v4 = vld [vmem:[%s2891_s7 + $0x8] sm:$0xff]  ;;  %v525_v6 = vld [vmem:[%s2891_s7 + $0x58] sm:$0xff] }
  0x22   :  { %366 = vmatpush.msrb.mxu1 %v304_v48  ;;  %435 = vmatpush.msrb.mxu0 %v316_v49  ;;  %v514_v5 = vld [vmem:[%s2891_s7] sm:$0xff]  ;;  %v524_v7 = vld [vmem:[%s2891_s7 + $0x50] sm:$0xff]  ;;  %v523_v8 = vld [vmem:[%s2891_s7 + $0x48] sm:$0xff] }
  0x23   :  { %480 = vmatpush.msrb.mxu2 %v325_v50  ;;  %503 = vmatpush.msrb.mxu3 %v329_v51  ;;  %v533_v9 = vld [vmem:[%s2891_s7 + $0x98] sm:$0xff]  ;;  %v522_v10 = vld [vmem:[%s2891_s7 + $0x40] sm:$0xff]  ;;  %v532_v14 = vld [vmem:[%s2891_s7 + $0x90] sm:$0xff] }
  0x24   :  { %1802 = vmatmul.msk.f32.vlgmr.msra.gmra.mxu1 %vm107_vm0, %v2104_v12  ;;  %1805 = vmatmul.msk.f32.gmra.mxu2 %vm107_vm0, %v2109_v13  ;;  %v529_v11 = vld [vmem:[%s2891_s7 + $0x78] sm:$0xff]  ;;  %v528_v15 = vld [vmem:[%s2891_s7 + $0x70] sm:$0xff]  ;;  %v531_v16 = vld [vmem:[%s2891_s7 + $0x88] sm:$0xff] }
  0x25   :  { %1807 = vmatmul.msk.f32.gmra.mxu3 %vm107_vm0, %v2109_v13  ;;  %1808 = vmatmul.msk.f32.vlgmr.msra.gmra.mxu0 %vm107_vm0, %v2104_v12  ;;  %v521_v17 = vld [vmem:[%s2891_s7 + $0x38] sm:$0xff]  ;;  %v520_v18 = vld [vmem:[%s2891_s7 + $0x30] sm:$0xff]  ;;  %v527_v19 = vld [vmem:[%s2891_s7 + $0x68] sm:$0xff] }
  0x26   :  { %367 = vmatpush.msrb.mxu1 %v303_v52  ;;  %436 = vmatpush.msrb.mxu0 %v315_v53  ;;  %v526_v20 = vld [vmem:[%s2891_s7 + $0x60] sm:$0xff]  ;;  %v519_v22 = vld [vmem:[%s2891_s7 + $0x28] sm:$0xff]  ;;  %v541_v23 = vld [vmem:[%s2891_s7 + $0xd8] sm:$0xff] }
  0x27   :  { %481 = vmatpush.msrb.mxu2 %v324_v54  ;;  %504 = vmatpush.msrb.mxu3 %v328_v55  ;;  %v530_v21 = vld [vmem:[%s2891_s7 + $0x80] sm:$0xff]  ;;  %v540_v25 = vld [vmem:[%s2891_s7 + $0xd0] sm:$0xff]  ;;  %v539_v26 = vld [vmem:[%s2891_s7 + $0xc8] sm:$0xff] }
  0x28   :  { %368 = vmatpush.msrb.mxu1 %v302_v56  ;;  %437 = vmatpush.msrb.mxu0 %v314_v57  ;;  %v518_v24 = vld [vmem:[%s2891_s7 + $0x20] sm:$0xff]  ;;  %v545_v28 = vld [vmem:[%s2891_s7 + $0xf8] sm:$0xff]  ;;  %v544_v31 = vld [vmem:[%s2891_s7 + $0xf0] sm:$0xff] }
  0x29   :  { %482 = vmatpush.msrb.mxu2 %v323_v58  ;;  %505 = vmatpush.msrb.mxu3 %v327_v59  ;;  %v538_v27 = vld [vmem:[%s2891_s7 + $0xc0] sm:$0xff]  ;;  %v537_v32 = vld [vmem:[%s2891_s7 + $0xb8] sm:$0xff]  ;;  %v543_v33 = vld [vmem:[%s2891_s7 + $0xe8] sm:$0xff] }
  0x2a   :  { %457 = vmatpush.msra.mxu1 %v321_v60  ;;  %558 = vmatpush.msra.mxu0 %v517_v2  ;;  %v536_v34 = vld [vmem:[%s2891_s7 + $0xb0] sm:$0xff]  ;;  %v542_v35 = vld [vmem:[%s2891_s7 + $0xe0] sm:$0xff]  ;;  %v535_v36 = vld [vmem:[%s2891_s7 + $0xa8] sm:$0xff] }
  0x2b   :  { %483 = vmatpush.msrb.mxu2 %v322_v61  ;;  %506 = vmatpush.msrb.mxu3 %v326_v62  ;;  %v534_v39 = vld [vmem:[%s2891_s7 + $0xa0] sm:$0xff]  ;;  %v60_v53 = vld [vmem:[%s2887_s3 + $0x8] sm:$0xff]  ;;  %s1780_s7 = sshll.u32 %s2894_s10, 4  ;;  %s1781_s7 = int_to_ptr.hbm [resolvable:$true] %s1780_s7 }
  0x2c   :  { %1803 = vmatmul.msk.f32.gmra.mxu1 %vm107_vm0, %v2109_v13  ;;  %1812 = vmatmul.msk.f32.vlgmr.msra.gmra.mxu2 %vm107_vm0, %v2104_v12  ;;  %v38_v42 = vld [vmem:[%s2885_s1] sm:$0xff] }
  0x2d   :  { %1809 = vmatmul.msk.f32.gmra.mxu0 %vm107_vm0, %v2109_v13  ;;  %1814 = vmatmul.msk.f32.vlgmr.msra.gmra.mxu3 %vm107_vm0, %v2104_v12  ;;  %vm40_vm1 = vcmp.ne.s32.totalorder %v38_v42, 0  ;;  %v59_v50 = vld [vmem:[%s2887_s3] sm:$0xff] }
  0x2e   :  { %458 = vmatpush.msra.mxu1 %v320_v63  ;;  %559 = vmatpush.msra.mxu0 %v516_v3  ;;  %v44_v44 = vsel %vm40_vm1, 1, %v1999_v43 }
  0x2f   :  { %604 = vmatpush.msra.mxu2 %v525_v6  ;;  %627 = vmatpush.msra.mxu3 %v529_v11 }
  0x30   :  { %459 = vmatpush.msra.mxu1 %v319_v0  ;;  %560 = vmatpush.msra.mxu0 %v515_v4 }
  0x31   :  { %605 = vmatpush.msra.mxu2 %v524_v7  ;;  %628 = vmatpush.msra.mxu3 %v528_v15 }
  0x32   :  { %460 = vmatpush.msra.mxu1 %v318_v1  ;;  %561 = vmatpush.msra.mxu0 %v514_v5 }
  0x33   :  { %606 = vmatpush.msra.mxu2 %v523_v8  ;;  %629 = vmatpush.msra.mxu3 %v527_v19 }
  0x34   :  { %1810 = vmatmul.msk.f32.vlgmr.msrb.gmra.mxu1 %vm107_vm0, %v2104_v12  ;;  %1813 = vmatmul.msk.f32.gmra.mxu2 %vm107_vm0, %v2109_v13 }
  0x35   :  { %1815 = vmatmul.msk.f32.gmra.mxu3 %vm107_vm0, %v2109_v13  ;;  %1816 = vmatmul.msk.f32.vlgmr.msrb.gmra.mxu0 %vm107_vm0, %v2104_v12 }
  0x36   :  { %650 = vmatpush.msrb.mxu0 %v533_v9  ;;  %607 = vmatpush.msra.mxu2 %v522_v10 }
  0x37   :  { %581 = vmatpush.msrb.mxu1 %v521_v17  ;;  %630 = vmatpush.msra.mxu3 %v526_v20 }
  0x38   :  { %651 = vmatpush.msrb.mxu0 %v532_v14  ;;  %1905 = vset.pattern.permute.xlu0 %v1999_v43 }
  0x39   :  { %582 = vmatpush.msrb.mxu1 %v520_v18  ;;  %1906 = vset.pattern.permute.xlu1 %v1999_v43 }
  0x3a   :  { %652 = vmatpush.msrb.mxu0 %v531_v16  ;;  %47 = vperm.xlu0 %1905, %v44_v44  }
  0x3b   :  { %583 = vmatpush.msrb.mxu1 %v519_v22 }
  0x3c   :  { %1811 = vmatmul.msk.f32.gmra.mxu1 %vm107_vm0, %v2109_v13  ;;  %1820 = vmatmul.msk.f32.vlgmr.msrb.gmra.mxu2 %vm107_vm0, %v2104_v12 }
  0x3d   :  { %1817 = vmatmul.msk.f32.gmra.mxu0 %vm107_vm0, %v2109_v13  ;;  %1822 = vmatmul.msk.f32.vlgmr.msrb.gmra.mxu3 %vm107_vm0, %v2104_v12 }
  0x3e   :  { %653 = vmatpush.msrb.mxu0 %v530_v21  ;;  %696 = vmatpush.msrb.mxu2 %v541_v23 }
  0x3f   :  { %584 = vmatpush.msrb.mxu1 %v518_v24  ;;  %719 = vmatpush.msrb.mxu3 %v545_v28 }
  0x40   :  { %697 = vmatpush.msrb.mxu2 %v540_v25 }
  0x41   :  { %720 = vmatpush.msrb.mxu3 %v544_v31 }
  0x42   :  { %698 = vmatpush.msrb.mxu2 %v539_v26  ;;  %63 = vperm.xlu0 %1905, %v59_v50   ;;  %v42_v26 = vld [vmem:[%s2884_s0] sm:$0x1]  ;;  %s2001_s0 = smov 4  }
  0x43   :  { %721 = vmatpush.msrb.mxu3 %v543_v33  ;;  %vm43_vm4 = vcmp.ne.s32.totalorder %v42_v26, 0 }
  0x44   :  { %1818 = vmatmul.msk.f32.vlgmr.msra.gmra.mxu1 %vm107_vm0, %v2104_v12  ;;  %1821 = vmatmul.msk.f32.gmra.mxu2 %vm107_vm0, %v2109_v13  ;;  %v54_v28 = vsel %vm43_vm4, 1, %v1999_v43 }
  0x45   :  { %1823 = vmatmul.msk.f32.gmra.mxu3 %vm107_vm0, %v2109_v13  ;;  %1824 = vmatmul.msk.f32.vlgmr.msra.gmra.mxu0 %vm107_vm0, %v2104_v12 }
  0x46   :  { %699 = vmatpush.msrb.mxu2 %v538_v27  ;;  %673 = vmatpush.msra.mxu1 %v537_v32  ;;  %v1907_v32 = vld [vmem:[%s2886_s2] ss:$0 sm:$0xff]  ;;  %s2002_s2 = smov 8  }
  0x47   :  { %722 = vmatpush.msrb.mxu3 %v542_v35  ;;  %v2000_v35 = vmov -3.4028235e+38  }
  0x48   :  { %674 = vmatpush.msra.mxu1 %v536_v34 }
  0x4a   :  { %675 = vmatpush.msra.mxu1 %v535_v36 }
  0x4c   :  { %1819 = vmatmul.msk.f32.gmra.mxu1 %vm107_vm0, %v2109_v13  ;;  %1828 = vmatmul.msk.f32.vlgmr.msra.gmra.mxu2 %vm107_vm0, %v2104_v12 }
  0x4d   :  { %1825 = vmatmul.msk.f32.gmra.mxu0 %vm107_vm0, %v2109_v13  ;;  %1830 = vmatmul.msk.f32.vlgmr.msra.gmra.mxu3 %vm107_vm0, %v2104_v12 }
  0x4e   :  { %676 = vmatpush.msra.mxu1 %v534_v39 }
  0x54   :  { %1829 = vmatmul.msk.f32.gmra.mxu2 %vm107_vm0, %v2109_v13  ;;  %1826 = vmatmul.msk.f32.vlgmr.msrb.gmra.mxu1 %vm107_vm0, %v2104_v12 }
  0x55   :  { %1832 = vmatmul.msk.f32.vlgmr.msrb.gmra.mxu0 %vm107_vm0, %v2104_v12  ;;  %1831 = vmatmul.msk.f32.gmra.mxu3 %vm107_vm0, %v2109_v13 }
  0x5c   :  { %1836 = vmatmul.msk.f32.vlgmr.msrb.gmra.mxu2 %vm107_vm0, %v2104_v12  ;;  %1827 = vmatmul.msk.f32.gmra.mxu1 %vm107_vm0, %v2109_v13 }
  0x5d   :  { %1833 = vmatmul.msk.f32.gmra.mxu0 %vm107_vm0, %v2109_v13  ;;  %1838 = vmatmul.msk.f32.vlgmr.msrb.gmra.mxu3 %vm107_vm0, %v2104_v12 }
  0x64   :  { %1837 = vmatmul.msk.f32.gmra.mxu2 %vm107_vm0, %v2109_v13  ;;  %1834 = vmatmul.msk.f32.vlgmr.msra.gmra.mxu1 %vm107_vm0, %v2104_v12  ;;  %v39_v12 = vld [vmem:[%s2885_s1 + $0x8] sm:$0xff] }
  0x65   :  { %1839 = vmatmul.msk.f32.gmra.mxu3 %vm107_vm0, %v2109_v13  ;;  %vm41_vm2 = vcmp.ne.s32.totalorder %v39_v12, 0 }
  0x66   :  { %v45_v47 = vsel %vm41_vm2, 1, %v1999_v43 }
  0x67   :  { %50 = vperm.xlu1 %1906, %v45_v47  }
  0x6c   :  { %1835 = vmatmul.msk.f32.gmra.mxu1 %vm107_vm0, %v2109_v13 }
  0x6f   :  { %66 = vperm.xlu1 %1906, %v60_v53  }
  0x87   :  { %v131_v29 = vpop.f32.mrf.mxu0 }
  0x88   :  { %v2424_v30 = vpop.f32.mrf.mxu1 }
  0x8e   :  { %v177_v37 = vpop.f32.mrf.mxu2 }
  0x8f   :  { %v200_v38 = vpop.f32.mrf.mxu3 }
  0x90   :  { %v154_v40 = vpop.f32.mrf.mxu1 }
  0x92   :  { %v223_v41 = vpop.f32.mrf.mxu0 }
  0x97   :  { %v180_v45 = vpop.f32.mrf.mxu2 }
  0x98   :  { %v203_v46 = vpop.f32.mrf.mxu3 }
  0x99   :  { %v157_v48 = vpop.f32.mrf.mxu1 }
  0x9a   :  { %v226_v49 = vpop.f32.mrf.mxu0 }
  0x9f   :  { %v269_v51 = vpop.f32.mrf.mxu2 }
  0xa0   :  { %v292_v52 = vpop.f32.mrf.mxu3 }
  0xa1   :  { %v246_v54 = vpop.f32.mrf.mxu1 }
  0xa2   :  { %v347_v55 = vpop.f32.mrf.mxu0 }
  0xa7   :  { %v272_v56 = vpop.f32.mrf.mxu2 }
  0xa8   :  { %v295_v57 = vpop.f32.mrf.mxu3 }
  0xa9   :  { %v249_v58 = vpop.f32.mrf.mxu1 }
  0xaa   :  { %v350_v59 = vpop.f32.mrf.mxu0 }
  0xab   :  { %1840 = vmatpush.xpose.msk.msra.mxu0 %vm730_vm3, %v350_v59 }
  0xaf   :  { %1841 = vmatpush.xpose.msk.msra.mxu0 %vm730_vm3, %v347_v55  ;;  %v393_v13 = vpop.f32.mrf.mxu2 }
  0xb0   :  { %v416_v60 = vpop.f32.mrf.mxu3 }
  0xb1   :  { %v370_v61 = vpop.f32.mrf.mxu1 }
  0xb2   :  { %v439_v62 = vpop.f32.mrf.mxu0  ;;  %1842 = vmatmul.msk.f32.vlgmr.msra.gmra.mxu0 %vm730_vm3, %v131_v29  ;;  %v48_v29 = vpop.permute.xlu0 %47 }
  0xb3   :  { %vm52_vm6 = vcmp.eq.s32.totalorder %v48_v29, 1 }
  0xb7   :  { %v396_v63 = vpop.f32.mrf.mxu2 }
  0xb8   :  { %v419_v0 = vpop.f32.mrf.mxu3  ;;  %1848 = vmatpush.xpose.msk.msra.mxu2 %vm730_vm3, %v396_v63 }
  0xb9   :  { %1852 = vmatpush.xpose.msk.msra.mxu3 %vm730_vm3, %v419_v0  ;;  %v373_v1 = vpop.f32.mrf.mxu1 }
  0xba   :  { %v442_v2 = vpop.f32.mrf.mxu0  ;;  %1843 = vmatmul.msk.f32.gmra.mxu0 %vm730_vm3, %v2424_v30  ;;  %1844 = vmatpush.xpose.msk.msrb.mxu1 %vm730_vm3, %v373_v1  ;;  %v55_v30 = vperm.slane %v54_v28, 0  ;;  %v64_v34 = vpop.permute.xlu0 %63 }
  0xbb   :  { %1856 = vmatpush.xpose.msk.msrb.mxu0 %vm730_vm3, %v442_v2  ;;  %vm69_vm8 = vcmp.eq.s32.totalorder %v64_v34, %v1907_v32 }
  0xbc   :  { %1849 = vmatpush.xpose.msk.msra.mxu2 %vm730_vm3, %v393_v13  ;;  %vm2514_vm5 = vcmp.eq.s32.totalorder %v55_v30, 1 }
  0xbd   :  { %1853 = vmatpush.xpose.msk.msra.mxu3 %vm730_vm3, %v416_v60  ;;  %vm57_vm7 = vmand %vm52_vm6, %vm2514_vm5 }
  0xbe   :  { %1845 = vmatpush.xpose.msk.msrb.mxu1 %vm730_vm3, %v370_v61  ;;  %v71_v36 = vsel %vm57_vm7, 0.0, %v2000_v35 }
  0xbf   :  { %1857 = vmatpush.xpose.msk.msrb.mxu0 %vm730_vm3, %v439_v62  ;;  %v485_v3 = vpop.f32.mrf.mxu2  ;;  %1850 = vmatmul.msk.f32.vlgmr.msra.gmra.mxu2 %vm730_vm3, %v177_v37  ;;  %v2523_v37 = vsel %vm69_vm8, %v71_v36, -inf }
  0xc0   :  { %v508_v4 = vpop.f32.mrf.mxu3  ;;  %1854 = vmatmul.msk.f32.vlgmr.msra.gmra.mxu3 %vm730_vm3, %v200_v38 }
  0xc1   :  { %v462_v5 = vpop.f32.mrf.mxu1  ;;  %1846 = vmatmul.msk.f32.vlgmr.msrb.gmra.mxu1 %vm730_vm3, %v154_v40 }
  0xc2   :  { %1858 = vmatmul.msk.f32.vlgmr.msrb.gmra.mxu0 %vm730_vm3, %v223_v41  ;;  %v563_v9 = vpop.f32.mrf.mxu0 }
  0xc7   :  { %v488_v6 = vpop.f32.mrf.mxu2  ;;  %1851 = vmatmul.msk.f32.gmra.mxu2 %vm730_vm3, %v180_v45 }
  0xc8   :  { %v511_v7 = vpop.f32.mrf.mxu3  ;;  %1855 = vmatmul.msk.f32.gmra.mxu3 %vm730_vm3, %v203_v46  ;;  %1864 = vmatpush.xpose.msk.msrb.mxu2 %vm730_vm3, %v488_v6 }
  0xc9   :  { %1868 = vmatpush.xpose.msk.msrb.mxu3 %vm730_vm3, %v511_v7  ;;  %v465_v8 = vpop.f32.mrf.mxu1  ;;  %1847 = vmatmul.msk.f32.gmra.mxu1 %vm730_vm3, %v157_v48 }
  0xca   :  { %1859 = vmatmul.msk.f32.gmra.mxu0 %vm730_vm3, %v226_v49  ;;  %1860 = vmatpush.xpose.msk.msra.mxu1 %vm730_vm3, %v465_v8  ;;  %v566_v10 = vpop.f32.mrf.mxu0 }
  0xcb   :  { %1448 = vmatpush.msra.mxu0 %v566_v10 }
  0xcc   :  { %1865 = vmatpush.xpose.msk.msrb.mxu2 %vm730_vm3, %v485_v3 }
  0xcd   :  { %1869 = vmatpush.xpose.msk.msrb.mxu3 %vm730_vm3, %v508_v4  ;;  %1449 = vmatpush.msra.mxu0 %v563_v9 }
  0xce   :  { %1861 = vmatpush.xpose.msk.msra.mxu1 %vm730_vm3, %v462_v5 }
  0xcf   :  { %1866 = vmatmul.msk.f32.vlgmr.msrb.gmra.mxu2 %vm730_vm3, %v269_v51  ;;  %v609_v11 = vpop.f32.mrf.mxu2 }
  0xd0   :  { %1870 = vmatmul.msk.f32.vlgmr.msrb.gmra.mxu3 %vm730_vm3, %v292_v52  ;;  %v632_v16 = vpop.f32.mrf.mxu3 }
  0xd1   :  { %1862 = vmatmul.msk.f32.vlgmr.msra.gmra.mxu1 %vm730_vm3, %v246_v54  ;;  %v586_v15 = vpop.f32.mrf.mxu1 }
  0xd2   :  { %v655_v14 = vpop.f32.mrf.mxu0 }
  0xd7   :  { %1867 = vmatmul.msk.f32.gmra.mxu2 %vm730_vm3, %v272_v56  ;;  %v612_v17 = vpop.f32.mrf.mxu2 }
  0xd8   :  { %1871 = vmatmul.msk.f32.gmra.mxu3 %vm730_vm3, %v295_v57  ;;  %1506 = vmatpush.msra.mxu2 %v612_v17  ;;  %v635_v20 = vpop.f32.mrf.mxu3 }
  0xd9   :  { %1863 = vmatmul.msk.f32.gmra.mxu1 %vm730_vm3, %v249_v58  ;;  %v589_v19 = vpop.f32.mrf.mxu1  ;;  %1535 = vmatpush.msra.mxu3 %v635_v20  ;;  %v51_v33 = vpop.permute.xlu1 %50 }
  0xda   :  { %v658_v18 = vpop.f32.mrf.mxu0  ;;  %1507 = vmatpush.msra.mxu2 %v609_v11  ;;  %1477 = vmatpush.msrb.mxu1 %v589_v19  ;;  %vm53_vm9 = vcmp.eq.s32.totalorder %v51_v33, 1 }
  0xdb   :  { %1564 = vmatpush.msrb.mxu0 %v658_v18  ;;  %1536 = vmatpush.msra.mxu3 %v632_v16  ;;  %vm58_vm11 = vmand %vm53_vm9, %vm2514_vm5 }
  0xdc   :  { %1478 = vmatpush.msrb.mxu1 %v586_v15  ;;  %v72_v43 = vsel %vm58_vm11, 0.0, %v2000_v35 }
  0xdd   :  { %1565 = vmatpush.msrb.mxu0 %v655_v14 }
  0xdf   :  { %v701_v21 = vpop.f32.mrf.mxu2 }
  0xe0   :  { %v724_v23 = vpop.f32.mrf.mxu3 }
  0xe1   :  { %v678_v22 = vpop.f32.mrf.mxu1  ;;  %v67_v41 = vpop.permute.xlu1 %66 }
  0xe2   :  { %vm70_vm12 = vcmp.eq.s32.totalorder %v67_v41, %v1907_v32 }
  0xe3   :  { %v2532_v45 = vsel %vm70_vm12, %v72_v43, -inf }
  0xe7   :  { %v704_v24 = vpop.f32.mrf.mxu2 }
  0xe8   :  { %1622 = vmatpush.msrb.mxu2 %v704_v24  ;;  %v727_v27 = vpop.f32.mrf.mxu3 }
  0xe9   :  { %v681_v25 = vpop.f32.mrf.mxu1  ;;  %1651 = vmatpush.msrb.mxu3 %v727_v27 }
  0xea   :  { %1623 = vmatpush.msrb.mxu2 %v701_v21  ;;  %1593 = vmatpush.msra.mxu1 %v681_v25 }
  0xeb   :  { %1652 = vmatpush.msrb.mxu3 %v724_v23 }
  0xec   :  { %1594 = vmatpush.msra.mxu1 %v678_v22 }
 0x12f   :  { %v760_v38 = vpop.f32.mrf.mxu0 }
 0x130   :  { %v1011_v39 = vmul.f32 0.5, %v760_v38 }
 0x132   :  { %v2526_v40 = vadd.f32 %v1011_v39, %v2523_v37 }
 0x134   :  { %v1044_v42 = vsel %vm1043_vm10, %v2526_v40, -inf }
 0x135   :  { %1045 = vmax.xlane.f32.xlu0 %v1044_v42 }
 0x137   :  { %v763_v44 = vpop.f32.mrf.mxu0 }
 0x138   :  { %v1012_v12 = vmul.f32 0.5, %v763_v44 }
 0x13a   :  { %v2535_v46 = vadd.f32 %v1012_v12, %v2532_v45 }
 0x13c   :  { %v1047_v47 = vsel %vm1043_vm10, %v2535_v46, -inf }
 0x13d   :  { %1048 = vmax.xlane.f32.xlu2 %v1047_v47 }
 0x13e   :  { %v795_v48 = vpop.f32.mrf.mxu1 }
 0x13f   :  { %v1013_v49 = vmul.f32 0.5, %v795_v48  ;;  %v900_v50 = vpop.f32.mrf.mxu0 }
 0x140   :  { %v1019_v51 = vmul.f32 0.5, %v900_v50 }
 0x141   :  { %v2540_v52 = vadd.f32 %v1013_v49, %v2523_v37 }
 0x142   :  { %v830_v53 = vpop.f32.mrf.mxu2  ;;  %v2543_v54 = vadd.f32 %v1019_v51, %v2523_v37 }
 0x143   :  { %v1015_v55 = vmul.f32 0.5, %v830_v53  ;;  %v865_v56 = vpop.f32.mrf.mxu3  ;;  %v1050_v57 = vsel %vm1043_vm10, %v2540_v52, -inf }
 0x144   :  { %1051 = vmax.xlane.f32.xlu1 %v1050_v57  ;;  %v1068_v58 = vsel %vm1043_vm10, %v2543_v54, -inf  ;;  %v1017_v60 = vmul.f32 0.5, %v865_v56 }
 0x145   :  { %1069 = vmax.xlane.f32.xlu0 %v1068_v58  ;;  %v2550_v59 = vadd.f32 %v1015_v55, %v2523_v37 }
 0x146   :  { %v798_v13 = vpop.f32.mrf.mxu1  ;;  %v2555_v63 = vadd.f32 %v1017_v60, %v2523_v37 }
 0x147   :  { %v1056_v61 = vsel %vm1043_vm10, %v2550_v59, -inf  ;;  %v1014_v1 = vmul.f32 0.5, %v798_v13  ;;  %v903_v4 = vpop.f32.mrf.mxu0 }
 0x148   :  { %1057 = vmax.xlane.f32.xlu2 %v1056_v61  ;;  %v1062_v3 = vsel %vm1043_vm10, %v2555_v63, -inf  ;;  %v1020_v6 = vmul.f32 0.5, %v903_v4 }
 0x149   :  { %v2565_v9 = vadd.f32 %v1014_v1, %v2532_v45 }
 0x14a   :  { %v833_v10 = vpop.f32.mrf.mxu2  ;;  %v2570_v15 = vadd.f32 %v1020_v6, %v2532_v45 }
 0x14b   :  { %v868_v62 = vpop.f32.mrf.mxu3  ;;  %v1016_v11 = vmul.f32 0.5, %v833_v10  ;;  %v1053_v14 = vsel %vm1043_vm10, %v2565_v9, -inf }
 0x14c   :  { %v1071_v17 = vsel %vm1043_vm10, %v2570_v15, -inf  ;;  %v1018_v21 = vmul.f32 0.5, %v868_v62 }
 0x14d   :  { %v2575_v18 = vadd.f32 %v1016_v11, %v2532_v45 }
 0x14e   :  { %v935_v0 = vpop.f32.mrf.mxu1  ;;  %v2585_v24 = vadd.f32 %v1018_v21, %v2532_v45 }
 0x14f   :  { %v1021_v2 = vmul.f32 0.5, %v935_v0  ;;  %v1059_v22 = vsel %vm1043_vm10, %v2575_v18, -inf }
 0x150   :  { %1063 = vmax.xlane.f32.xlu2 %v1062_v3  ;;  %v1065_v27 = vsel %vm1043_vm10, %v2585_v24, -inf }
 0x151   :  { %v2560_v5 = vadd.f32 %v1021_v2, %v2523_v37 }
 0x152   :  { %v970_v25 = vpop.f32.mrf.mxu2 }
 0x153   :  { %v1005_v7 = vpop.f32.mrf.mxu3  ;;  %v1074_v8 = vsel %vm1043_vm10, %v2560_v5, -inf  ;;  %v1023_v26 = vmul.f32 0.5, %v970_v25 }
 0x154   :  { %1075 = vmax.xlane.f32.xlu1 %v1074_v8  ;;  %v1025_v29 = vmul.f32 0.5, %v1005_v7 }
 0x155   :  { %v2590_v28 = vadd.f32 %v1023_v26, %v2523_v37 }
 0x156   :  { %v2595_v31 = vadd.f32 %v1025_v29, %v2523_v37  ;;  %v938_v36 = vpop.f32.mrf.mxu1 }
 0x157   :  { %v1080_v30 = vsel %vm1043_vm10, %v2590_v28, -inf  ;;  %v1022_v38 = vmul.f32 0.5, %v938_v36 }
 0x158   :  { %1054 = vmax.xlane.f32.xlu2 %v1053_v14  ;;  %v1086_v34 = vsel %vm1043_vm10, %v2595_v31, -inf }
 0x159   :  { %v2605_v41 = vadd.f32 %v1022_v38, %v2532_v45 }
 0x15a   :  { %v973_v32 = vpop.f32.mrf.mxu2 }
 0x15b   :  { %v1008_v16 = vpop.f32.mrf.mxu3  ;;  %v1024_v33 = vmul.f32 0.5, %v973_v32  ;;  %v1077_v37 = vsel %vm1043_vm10, %v2605_v41, -inf }
 0x15c   :  { %v1026_v19 = vmul.f32 0.5, %v1008_v16  ;;  %1072 = vmax.xlane.f32.xlu1 %v1071_v17 }
 0x15d   :  { %v2600_v35 = vadd.f32 %v1024_v33, %v2532_v45 }
 0x15e   :  { %v2578_v20 = vadd.f32 %v1026_v19, %v2532_v45 }
 0x15f   :  { %v1083_v39 = vsel %vm1043_vm10, %v2600_v35, -inf }
 0x160   :  { %1060 = vmax.xlane.f32.xlu2 %v1059_v22  ;;  %v1089_v23 = vsel %vm1043_vm10, %v2578_v20, -inf }
 0x161   :  { %1090 = vmax.xlane.f32.xlu0 %v1089_v23 }
 0x168   :  { %1066 = vmax.xlane.f32.xlu2 %v1065_v27 }
 0x170   :  { %1081 = vmax.xlane.f32.xlu2 %v1080_v30 }
 0x178   :  { %1087 = vmax.xlane.f32.xlu2 %v1086_v34 }
 0x180   :  { %1084 = vmax.xlane.f32.xlu2 %v1083_v39 }
 0x188   :  { %1078 = vmax.xlane.f32.xlu2 %v1077_v37 }
 0x1a8   :  { %v1046_v42 = vpop.xlane.xlu0 %1045 }
 0x1a9   :  { %v1092_v43 = vsub.f32 %v2526_v40, %v1046_v42 }
 0x1ab   :  { %v1108_v44 = vmul.f32 1.442695, %v1092_v43 }
 0x1ad   :  { %1909 = vpow2.f32 %v1108_v44 }
 0x1b0   :  { %v1049_v47 = vpop.xlane.xlu2 %1048 }
 0x1b1   :  { %v1093_v40 = vsub.f32 %v2535_v46, %v1049_v47 }
 0x1b3   :  { %v2610_v12 = vpop.eup %1909  ;;  %v1110_v60 = vmul.f32 1.442695, %v1093_v40 }
 0x1b4   :  { %v1140_v48 = vsel %vm1043_vm10, %v2610_v12, 0.0 }
 0x1b5   :  { %1141 = vadd.xlane.f32.xlu2 %v1140_v48 }
 0x1b7   :  { %v1052_v49 = vpop.xlane.xlu1 %1051 }
 0x1b8   :  { %v1094_v45 = vsub.f32 %v2540_v52, %v1052_v49  ;;  %v1070_v8 = vpop.xlane.xlu0 %1069 }
 0x1b9   :  { %v1100_v16 = vsub.f32 %v2543_v54, %v1070_v8 }
 0x1ba   :  { %v1112_v50 = vmul.f32 1.442695, %v1094_v45 }
 0x1bb   :  { %v1058_v51 = vpop.xlane.xlu2 %1057 }
 0x1bc   :  { %1911 = vpow2.f32 %v1112_v50  ;;  %v1096_v53 = vsub.f32 %v2550_v59, %v1058_v51 }
 0x1be   :  { %v1116_v55 = vmul.f32 1.442695, %v1096_v53 }
 0x1c0   :  { %1913 = vpow2.f32 %v1116_v55 }
 0x1c2   :  { %v2616_v56 = vpop.eup %1911 }
 0x1c3   :  { %v1064_v57 = vpop.xlane.xlu2 %1063  ;;  %v1146_v58 = vsel %vm1043_vm10, %v2616_v56, 0.0 }
 0x1c4   :  { %v1098_v13 = vsub.f32 %v2555_v63, %v1064_v57  ;;  %1147 = vadd.xlane.f32.xlu0 %v1146_v58 }
 0x1c6   :  { %v1120_v52 = vmul.f32 1.442695, %v1098_v13  ;;  %v2622_v61 = vpop.eup %1913 }
 0x1c7   :  { %v1152_v62 = vsel %vm1043_vm10, %v2622_v61, 0.0 }
 0x1c8   :  { %1915 = vpow2.f32 %v1120_v52 }
 0x1c9   :  { %1917 = vpow2.f32 %v1110_v60 }
 0x1cb   :  { %v1055_v59 = vpop.xlane.xlu2 %1054 }
 0x1cc   :  { %1153 = vadd.xlane.f32.xlu0 %v1152_v62  ;;  %v1095_v4 = vsub.f32 %v2565_v9, %v1055_v59  ;;  %v1124_v9 = vmul.f32 1.442695, %v1100_v16 }
 0x1ce   :  { %v2626_v46 = vpop.eup %1915  ;;  %v1114_v7 = vmul.f32 1.442695, %v1095_v4 }
 0x1cf   :  { %v1158_v0 = vsel %vm1043_vm10, %v2626_v46, 0.0  ;;  %v2630_v1 = vpop.eup %1917 }
 0x1d0   :  { %1159 = vadd.xlane.f32.xlu1 %v1158_v0  ;;  %v1143_v2 = vsel %vm1043_vm10, %v2630_v1, 0.0 }
 0x1d3   :  { %v1061_v63 = vpop.xlane.xlu2 %1060 }
 0x1d4   :  { %v1097_v3 = vsub.f32 %v2575_v18, %v1061_v63  ;;  %1144 = vadd.xlane.f32.xlu0 %v1143_v2  ;;  %v1076_v18 = vpop.xlane.xlu1 %1075  ;;  %v1091_v23 = vpop.xlane.xlu0 %1090 }
 0x1d5   :  { %v1102_v54 = vsub.f32 %v2560_v5, %v1076_v18  ;;  %v1107_v27 = vsub.f32 %v2578_v20, %v1091_v23 }
 0x1d6   :  { %v1118_v6 = vmul.f32 1.442695, %v1097_v3 }
 0x1d7   :  { %v1128_v32 = vmul.f32 1.442695, %v1102_v54 }
 0x1d8   :  { %1919 = vpow2.f32 %v1118_v6 }
 0x1d9   :  { %1921 = vpow2.f32 %v1114_v7 }
 0x1db   :  { %v1067_v10 = vpop.xlane.xlu2 %1066 }
 0x1dc   :  { %v1099_v11 = vsub.f32 %v2585_v24, %v1067_v10  ;;  %v1073_v33 = vpop.xlane.xlu1 %1072 }
 0x1dd   :  { %v1101_v20 = vsub.f32 %v2570_v15, %v1073_v33 }
 0x1de   :  { %v2637_v14 = vpop.eup %1919  ;;  %v1122_v17 = vmul.f32 1.442695, %v1099_v11 }
 0x1df   :  { %v1155_v19 = vsel %vm1043_vm10, %v2637_v14, 0.0  ;;  %v2642_v22 = vpop.eup %1921  ;;  %v1126_v43 = vmul.f32 1.442695, %v1101_v20 }
 0x1e0   :  { %1923 = vpow2.f32 %v1122_v17  ;;  %1156 = vadd.xlane.f32.xlu1 %v1155_v19  ;;  %v1149_v30 = vsel %vm1043_vm10, %v2642_v22, 0.0 }
 0x1e1   :  { %1925 = vpow2.f32 %v1124_v9 }
 0x1e3   :  { %v1082_v21 = vpop.xlane.xlu2 %1081 }
 0x1e4   :  { %v1104_v25 = vsub.f32 %v2590_v28, %v1082_v21  ;;  %v1138_v28 = vmul.f32 1.442695, %v1107_v27 }
 0x1e6   :  { %v2645_v24 = vpop.eup %1923  ;;  %v1132_v26 = vmul.f32 1.442695, %v1104_v25 }
 0x1e7   :  { %v1161_v29 = vsel %vm1043_vm10, %v2645_v24, 0.0  ;;  %v2653_v36 = vpop.eup %1925 }
 0x1e8   :  { %1927 = vpow2.f32 %v1132_v26  ;;  %1162 = vadd.xlane.f32.xlu2 %v1161_v29  ;;  %1150 = vadd.xlane.f32.xlu1 %v1149_v30  ;;  %v1164_v42 = vsel %vm1043_vm10, %v2653_v36, 0.0 }
 0x1e9   :  { %1929 = vpow2.f32 %v1128_v32 }
 0x1ea   :  { %1931 = vpow2.f32 %v1138_v28 }
 0x1eb   :  { %v1088_v34 = vpop.xlane.xlu2 %1087 }
 0x1ec   :  { %v1106_v5 = vsub.f32 %v2595_v31, %v1088_v34 }
 0x1ee   :  { %v2656_v38 = vpop.eup %1927  ;;  %v1136_v39 = vmul.f32 1.442695, %v1106_v5 }
 0x1ef   :  { %v1176_v37 = vsel %vm1043_vm10, %v2656_v38, 0.0  ;;  %v2663_v47 = vpop.eup %1929 }
 0x1f0   :  { %1933 = vpow2.f32 %v1136_v39  ;;  %1177 = vadd.xlane.f32.xlu2 %v1176_v37  ;;  %1165 = vadd.xlane.f32.xlu1 %v1164_v42  ;;  %v2666_v48 = vpop.eup %1931  ;;  %v1170_v45 = vsel %vm1043_vm10, %v2663_v47, 0.0 }
 0x1f1   :  { %1935 = vpow2.f32 %v1126_v43  ;;  %v1185_v51 = vsel %vm1043_vm10, %v2666_v48, 0.0 }
 0x1f3   :  { %v1085_v44 = vpop.xlane.xlu2 %1084 }
 0x1f4   :  { %v1105_v31 = vsub.f32 %v2600_v35, %v1085_v44 }
 0x1f6   :  { %v2668_v15 = vpop.eup %1933  ;;  %v1134_v49 = vmul.f32 1.442695, %v1105_v31 }
 0x1f7   :  { %v1182_v50 = vsel %vm1043_vm10, %v2668_v15, 0.0  ;;  %v2676_v53 = vpop.eup %1935 }
 0x1f8   :  { %1937 = vpow2.f32 %v1134_v49  ;;  %1171 = vadd.xlane.f32.xlu2 %v1170_v45  ;;  %1183 = vadd.xlane.f32.xlu0 %v1182_v50  ;;  %v1167_v13 = vsel %vm1043_vm10, %v2676_v53, 0.0 }
 0x1f9   :  { %1186 = vadd.xlane.f32.xlu1 %v1185_v51 }
 0x1fb   :  { %v1079_v35 = vpop.xlane.xlu2 %1078 }
 0x1fc   :  { %v1103_v55 = vsub.f32 %v2605_v41, %v1079_v35 }
 0x1fe   :  { %v2679_v40 = vpop.eup %1937  ;;  %v1130_v57 = vmul.f32 1.442695, %v1103_v55 }
 0x1ff   :  { %v1179_v58 = vsel %vm1043_vm10, %v2679_v40, 0.0 }
 0x200   :  { %1939 = vpow2.f32 %v1130_v57  ;;  %1180 = vadd.xlane.f32.xlu0 %v1179_v58  ;;  %1168 = vadd.xlane.f32.xlu2 %v1167_v13 }
 0x206   :  { %v2685_v60 = vpop.eup %1939 }
 0x207   :  { %v1173_v52 = vsel %vm1043_vm10, %v2685_v60, 0.0 }
 0x208   :  { %1174 = vadd.xlane.f32.xlu0 %v1173_v52 }
 0x228   :  { %v1142_v59 = vpop.xlane.xlu2 %1141 }
 0x229   :  { %1941 = vrcp.f32 %v1142_v59  ;;  %v1199_v63 = vand.u32 2147483648, %v1142_v59  ;;  %v1197_v3 = vand.u32 2147483647, %v1142_v59  ;;  %vm1193_vm14 = vweird.f32 %v1142_v59 }
 0x22b   :  { %v1200_v6 = vor.u32 1.1754944e-38, %v1199_v63  ;;  %vm1198_vm1 = vcmp.eq.f32.partialorder %v1197_v3, 8.507059e+37 }
 0x22f   :  { %v1942_v41 = vpop.eup %1941 }
 0x230   :  { %v1189_v62 = vmul.f32 %v1942_v41, %v1142_v59  ;;  %vm1194_vm13 = vweird.f32 %v1942_v41 }
 0x231   :  { %vm1195_vm15 = vmor %vm1193_vm14, %vm1194_vm13 }
 0x232   :  { %v1190_v0 = vsub.f32 1.0, %v1189_v62 }
 0x234   :  { %v1191_v2 = vmul.f32 %v1942_v41, %v1190_v0 }
 0x236   :  { %v1192_v4 = vadd.f32 %v1942_v41, %v1191_v2 }
 0x237   :  { %v1148_v7 = vpop.xlane.xlu0 %1147 }
 0x238   :  { %v1196_v8 = vsel %vm1195_vm15, %v1942_v41, %v1192_v4  ;;  %1943 = vrcp.f32 %v1148_v7  ;;  %v1229_v9 = vand.u32 2147483648, %v1148_v7  ;;  %v1227_v23 = vand.u32 2147483647, %v1148_v7 }
 0x239   :  { %v1201_v10 = vsel %vm1198_vm1, %v1200_v6, %v1196_v8  ;;  %vm1223_vm4 = vweird.f32 %v1148_v7 }
 0x23a   :  { %v1202_v11 = vmul.f32 %v2610_v12, %v1201_v10  ;;  %v1230_v27 = vor.u32 1.1754944e-38, %v1229_v9  ;;  %vm1228_vm6 = vcmp.eq.f32.partialorder %v1227_v23, 8.507059e+37 }
 0x23c   :  { %1872 = vmatmul.msk.f32.vlgmr.msra.gmra.mxu0 %vm1043_vm10, %v1202_v11 }
 0x23e   :  { %v1944_v16 = vpop.eup %1943 }
 0x23f   :  { %v1219_v17 = vmul.f32 %v1944_v16, %v1148_v7  ;;  %v1154_v19 = vpop.xlane.xlu0 %1153  ;;  %vm1224_vm2 = vweird.f32 %v1944_v16 }
 0x240   :  { %1945 = vrcp.f32 %v1154_v19  ;;  %vm1225_vm5 = vmor %vm1223_vm4, %vm1224_vm2  ;;  %v1257_v5 = vand.u32 2147483647, %v1154_v19  ;;  %v1259_v20 = vand.u32 2147483648, %v1154_v19  ;;  %vm1253_vm8 = vweird.f32 %v1154_v19 }
 0x241   :  { %v1220_v18 = vsub.f32 1.0, %v1219_v17 }
 0x242   :  { %vm1258_vm11 = vcmp.eq.f32.partialorder %v1257_v5, 8.507059e+37  ;;  %v1260_v31 = vor.u32 1.1754944e-38, %v1259_v20 }
 0x243   :  { %v1221_v21 = vmul.f32 %v1944_v16, %v1220_v18  ;;  %v1160_v25 = vpop.xlane.xlu1 %1159 }
 0x244   :  { %1947 = vrcp.f32 %v1160_v25  ;;  %v1287_v49 = vand.u32 2147483647, %v1160_v25  ;;  %v1289_v45 = vand.u32 2147483648, %v1160_v25  ;;  %vm1283_vm13 = vweird.f32 %v1160_v25 }
 0x245   :  { %v1222_v54 = vadd.f32 %v1944_v16, %v1221_v21 }
 0x246   :  { %v1946_v26 = vpop.eup %1945  ;;  %vm1288_vm15 = vcmp.eq.f32.partialorder %v1287_v49, 8.507059e+37  ;;  %v1290_v13 = vor.u32 1.1754944e-38, %v1289_v45 }
 0x247   :  { %v1226_v29 = vsel %vm1225_vm5, %v1944_v16, %v1222_v54  ;;  %v1249_v12 = vmul.f32 %v1946_v26, %v1154_v19  ;;  %v1145_v30 = vpop.xlane.xlu0 %1144  ;;  %vm1254_vm7 = vweird.f32 %v1946_v26 }
 0x248   :  { %v1231_v32 = vsel %vm1228_vm6, %v1230_v27, %v1226_v29  ;;  %1949 = vrcp.f32 %v1145_v30  ;;  %vm1255_vm9 = vmor %vm1253_vm8, %vm1254_vm7  ;;  %v1214_v52 = vand.u32 2147483648, %v1145_v30  ;;  %v1212_v0 = vand.u32 2147483647, %v1145_v30 }
 0x249   :  { %v1250_v33 = vsub.f32 1.0, %v1249_v12  ;;  %v1232_v28 = vmul.f32 %v2616_v56, %v1231_v32  ;;  %vm1208_vm2 = vweird.f32 %v1145_v30 }
 0x24a   :  { %v1948_v34 = vpop.eup %1947  ;;  %v1215_v4 = vor.u32 1.1754944e-38, %v1214_v52  ;;  %vm1213_vm5 = vcmp.eq.f32.partialorder %v1212_v0, 8.507059e+37 }
 0x24b   :  { %v1251_v39 = vmul.f32 %v1946_v26, %v1250_v33  ;;  %v1279_v37 = vmul.f32 %v1948_v34, %v1160_v25  ;;  %1874 = vmatmul.msk.f32.vlgmr.msrb.gmra.mxu1 %vm1043_vm10, %v1232_v28  ;;  %vm1284_vm12 = vweird.f32 %v1948_v34 }
 0x24c   :  { %vm1285_vm14 = vmor %vm1283_vm13, %vm1284_vm12 }
 0x24d   :  { %v1252_v42 = vadd.f32 %v1946_v26, %v1251_v39  ;;  %v1280_v43 = vsub.f32 1.0, %v1279_v37 }
 0x24e   :  { %v1950_v44 = vpop.eup %1949 }
 0x24f   :  { %v1256_v50 = vsel %vm1255_vm9, %v1946_v26, %v1252_v42  ;;  %v1281_v51 = vmul.f32 %v1948_v34, %v1280_v43  ;;  %v1204_v56 = vmul.f32 %v1950_v44, %v1145_v30  ;;  %vm1209_vm1 = vweird.f32 %v1950_v44 }
 0x250   :  { %v1261_v35 = vsel %vm1258_vm11, %v1260_v31, %v1256_v50  ;;  %vm1210_vm4 = vmor %vm1208_vm2, %vm1209_vm1 }
 0x251   :  { %v1282_v55 = vadd.f32 %v1948_v34, %v1281_v51  ;;  %v1205_v57 = vsub.f32 1.0, %v1204_v56  ;;  %v1262_v58 = vmul.f32 %v2622_v61, %v1261_v35 }
 0x253   :  { %v1286_v59 = vsel %vm1285_vm14, %v1948_v34, %v1282_v55  ;;  %v1206_v41 = vmul.f32 %v1950_v44, %v1205_v57  ;;  %1876 = vmatmul.msk.f32.vlgmr.msra.gmra.mxu2 %vm1043_vm10, %v1262_v58  ;;  %v1157_v62 = vpop.xlane.xlu1 %1156 }
 0x254   :  { %v1291_v63 = vsel %vm1288_vm15, %v1290_v13, %v1286_v59  ;;  %1951 = vrcp.f32 %v1157_v62  ;;  %v1274_v19 = vand.u32 2147483648, %v1157_v62  ;;  %vm1268_vm7 = vweird.f32 %v1157_v62 }
 0x255   :  { %v1292_v2 = vmul.f32 %v2626_v46, %v1291_v63  ;;  %v1207_v3 = vadd.f32 %v1950_v44, %v1206_v41  ;;  %v1272_v21 = vand.u32 2147483647, %v1157_v62 }
 0x256   :  { %v1275_v29 = vor.u32 1.1754944e-38, %v1274_v19 }
 0x257   :  { %1878 = vmatmul.msk.f32.vlgmr.msra.gmra.mxu3 %vm1043_vm10, %v1292_v2  ;;  %v1211_v61 = vsel %vm1210_vm4, %v1950_v44, %v1207_v3  ;;  %vm1273_vm9 = vcmp.eq.f32.partialorder %v1272_v21, 8.507059e+37 }
 0x258   :  { %v1216_v6 = vsel %vm1213_vm5, %v1215_v4, %v1211_v61 }
 0x259   :  { %v1217_v7 = vmul.f32 %v2630_v1, %v1216_v6 }
 0x25a   :  { %v1952_v8 = vpop.eup %1951 }
 0x25b   :  { %v1264_v10 = vmul.f32 %v1952_v8, %v1157_v62  ;;  %v1163_v11 = vpop.xlane.xlu2 %1162  ;;  %1873 = vmatmul.msk.f32.gmra.mxu0 %vm1043_vm10, %v1217_v7  ;;  %v2699_v16 = vpop.xlane.xlu1 %1150  ;;  %vm1269_vm6 = vweird.f32 %v1952_v8 }
 0x25c   :  { %1953 = vrcp.f32 %v1163_v11  ;;  %vm1270_vm8 = vmor %vm1268_vm7, %vm1269_vm6  ;;  %v1304_v30 = vand.u32 2147483648, %v1163_v11  ;;  %v1244_v28 = vand.u32 2147483648, %v2699_v16  ;;  %v1242_v5 = vand.u32 2147483647, %v2699_v16 }
 0x25d   :  { %v1265_v17 = vsub.f32 1.0, %v1264_v10  ;;  %1955 = vrcp.f32 %v2699_v16  ;;  %v1302_v39 = vand.u32 2147483647, %v1163_v11  ;;  %vm1298_vm11 = vweird.f32 %v1163_v11 }
 0x25e   :  { %vm1238_vm12 = vweird.f32 %v2699_v16  ;;  %v1305_v31 = vor.u32 1.1754944e-38, %v1304_v30  ;;  %v1245_v49 = vor.u32 1.1754944e-38, %v1244_v28  ;;  %vm2728_vm14 = vcmp.eq.f32.partialorder %v1242_v5, 8.507059e+37 }
 0x25f   :  { %v1266_v46 = vmul.f32 %v1952_v8, %v1265_v17  ;;  %vm2736_vm15 = vcmp.eq.f32.partialorder %v1302_v39, 8.507059e+37 }
 0x261   :  { %v1267_v18 = vadd.f32 %v1952_v8, %v1266_v46 }
 0x262   :  { %v2702_v9 = vpop.eup %1953 }
 0x263   :  { %v2704_v1 = vpop.eup %1955  ;;  %v1294_v23 = vmul.f32 %v2702_v9, %v1163_v11  ;;  %v1178_v25 = vpop.xlane.xlu2 %1177  ;;  %v1271_v27 = vsel %vm1270_vm8, %v1952_v8, %v1267_v18  ;;  %vm1299_vm13 = vweird.f32 %v2702_v9 }
 0x264   :  { %v2707_v54 = vpop.xlane.xlu1 %1165  ;;  %v1234_v26 = vmul.f32 %v2704_v1, %v2699_v16  ;;  %1957 = vrcp.f32 %v1178_v25  ;;  %v1276_v34 = vsel %vm1273_vm9, %v1275_v29, %v1271_v27  ;;  %v1377_v56 = vand.u32 2147483647, %v1178_v25  ;;  %vm2746_vm2 = vmor %vm1298_vm11, %vm1299_vm13 }
 0x265   :  { %v1295_v12 = vsub.f32 1.0, %v1294_v23  ;;  %1959 = vrcp.f32 %v2707_v54  ;;  %v1277_v20 = vmul.f32 %v2637_v14, %v1276_v34  ;;  %vm1239_vm1 = vweird.f32 %v2704_v1 }
 0x266   :  { %v1235_v32 = vsub.f32 1.0, %v1234_v26  ;;  %v1379_v59 = vand.u32 2147483648, %v1178_v25  ;;  %v1317_v62 = vand.u32 2147483647, %v2707_v54  ;;  %v1319_v2 = vand.u32 2147483648, %v2707_v54  ;;  %vm1240_vm8 = vmor %vm1238_vm12, %vm1239_vm1 }
 0x267   :  { %v1296_v33 = vmul.f32 %v2702_v9, %v1295_v12  ;;  %1877 = vmatmul.msk.f32.gmra.mxu2 %vm1043_vm10, %v1277_v20  ;;  %vm1373_vm5 = vweird.f32 %v1178_v25  ;;  %vm1313_vm6 = vweird.f32 %v2707_v54  ;;  %vm2762_vm9 = vcmp.eq.f32.partialorder %v1377_v56, 8.507059e+37 }
 0x268   :  { %v1236_v37 = vmul.f32 %v2704_v1, %v1235_v32  ;;  %v1380_v11 = vor.u32 1.1754944e-38, %v1379_v59  ;;  %vm1318_vm13 = vcmp.eq.f32.partialorder %v1317_v62, 8.507059e+37 }
 0x269   :  { %v1297_v43 = vadd.f32 %v2702_v9, %v1296_v33 }
 0x26a   :  { %v2717_v42 = vpop.eup %1957  ;;  %v1237_v13 = vadd.f32 %v2704_v1, %v1236_v37 }
 0x26b   :  { %v1960_v44 = vpop.eup %1959  ;;  %v1369_v45 = vmul.f32 %v2717_v42, %v1178_v25  ;;  %v2724_v14 = vpop.xlane.xlu2 %1171  ;;  %v1301_v0 = vsel %vm2746_vm2, %v2702_v9, %v1297_v43  ;;  %vm1374_vm4 = vweird.f32 %v2717_v42  ;;  %v1320_v9 = vor.u32 1.1754944e-38, %v1319_v2 }
 0x26c   :  { %v2726_v50 = vpop.xlane.xlu0 %1183  ;;  %v1309_v35 = vmul.f32 %v1960_v44, %v2707_v54  ;;  %1961 = vrcp.f32 %v2724_v14  ;;  %v2734_v55 = vpop.xlane.xlu1 %1186  ;;  %vm1314_vm7 = vweird.f32 %v1960_v44  ;;  %v1241_v6 = vsel %vm1240_vm8, %v2704_v1, %v1237_v13  ;;  %vm2769_vm11 = vmor %vm1373_vm5, %vm1374_vm4 }
 0x26d   :  { %v1370_v58 = vsub.f32 1.0, %v1369_v45  ;;  %1963 = vrcp.f32 %v2726_v50  ;;  %v1306_v7 = vsel %vm2736_vm15, %v1305_v31, %v1301_v0  ;;  %v1246_v16 = vsel %vm2728_vm14, %v1245_v49, %v1241_v6  ;;  %vm1315_vm12 = vmor %vm1313_vm6, %vm1314_vm7 }
 0x26e   :  { %v1310_v41 = vsub.f32 1.0, %v1309_v35  ;;  %1965 = vrcp.f32 %v2734_v55  ;;  %v1307_v46 = vmul.f32 %v2645_v24, %v1306_v7  ;;  %v1347_v25 = vand.u32 2147483647, %v2724_v14 }
 0x26f   :  { %v1371_v63 = vmul.f32 %v2717_v42, %v1370_v58  ;;  %v1349_v26 = vand.u32 2147483648, %v2724_v14  ;;  %v1247_v30 = vmul.f32 %v2642_v22, %v1246_v16  ;;  %v1407_v28 = vand.u32 2147483647, %v2726_v50 }
 0x270   :  { %v1311_v3 = vmul.f32 %v1960_v44, %v1310_v41  ;;  %1879 = vmatmul.msk.f32.gmra.mxu3 %vm1043_vm10, %v1307_v46  ;;  %v1409_v20 = vand.u32 2147483648, %v2726_v50  ;;  %vm1343_vm1 = vweird.f32 %v2724_v14  ;;  %vm1403_vm2 = vweird.f32 %v2726_v50 }
 0x271   :  { %v1372_v4 = vadd.f32 %v2717_v42, %v1371_v63  ;;  %1875 = vmatmul.msk.f32.gmra.mxu1 %vm1043_vm10, %v1247_v30  ;;  %vm1348_vm5 = vcmp.eq.f32.partialorder %v1347_v25, 8.507059e+37  ;;  %vm1408_vm6 = vcmp.eq.f32.partialorder %v1407_v28, 8.507059e+37  ;;  %v1422_v62 = vand.u32 2147483647, %v2734_v55 }
 0x272   :  { %v1962_v8 = vpop.eup %1961  ;;  %v1312_v17 = vadd.f32 %v1960_v44, %v1311_v3  ;;  %v1410_v51 = vor.u32 1.1754944e-38, %v1409_v20 }
 0x273   :  { %v1964_v19 = vpop.eup %1963  ;;  %v1376_v18 = vsel %vm2769_vm11, %v2717_v42, %v1372_v4  ;;  %v1339_v21 = vmul.f32 %v1962_v8, %v2724_v14  ;;  %v2788_v27 = vpop.xlane.xlu2 %1168  ;;  %vm1344_vm14 = vweird.f32 %v1962_v8  ;;  %v1424_v14 = vand.u32 2147483648, %v2734_v55 }
 0x274   :  { %v2782_v1 = vpop.xlane.xlu0 %1180  ;;  %v1316_v23 = vsel %vm1315_vm12, %v1960_v44, %v1312_v17  ;;  %v1399_v24 = vmul.f32 %v1964_v19, %v2726_v50  ;;  %v2790_v29 = vpop.eup %1965  ;;  %v1381_v32 = vsel %vm2762_vm9, %v1380_v11, %v1376_v18  ;;  %vm1404_vm15 = vweird.f32 %v1964_v19  ;;  %vm1345_vm4 = vmor %vm1343_vm1, %vm1344_vm14 }
 0x275   :  { %v1321_v54 = vsel %vm1318_vm13, %v1320_v9, %v1316_v23  ;;  %v1340_v12 = vsub.f32 1.0, %v1339_v21  ;;  %1967 = vrcp.f32 %v2782_v1  ;;  %v1414_v34 = vmul.f32 %v2790_v29, %v2734_v55  ;;  %vm1405_vm7 = vmor %vm1403_vm2, %vm1404_vm15 }
 0x276   :  { %v1400_v33 = vsub.f32 1.0, %v1399_v24  ;;  %1969 = vrcp.f32 %v2788_v27  ;;  %v1322_v37 = vmul.f32 %v2653_v36, %v1321_v54  ;;  %v1382_v43 = vmul.f32 %v2656_v38, %v1381_v32 }
 0x277   :  { %v1341_v5 = vmul.f32 %v1962_v8, %v1340_v12  ;;  %v1415_v39 = vsub.f32 1.0, %v1414_v34  ;;  %v1350_v44 = vor.u32 1.1754944e-38, %v1349_v26  ;;  %vm1419_vm8 = vweird.f32 %v2790_v29 }
 0x278   :  { %v1401_v22 = vmul.f32 %v1964_v19, %v1400_v33  ;;  %1880 = vmatmul.msk.f32.vlgmr.msrb.gmra.mxu0 %vm1043_vm10, %v1322_v37  ;;  %1884 = vmatmul.msk.f32.vlgmr.msrb.gmra.mxu2 %vm1043_vm10, %v1382_v43  ;;  %vm1418_vm9 = vweird.f32 %v2734_v55  ;;  %v1425_v0 = vor.u32 1.1754944e-38, %v1424_v14  ;;  %v1394_v63 = vand.u32 2147483648, %v2782_v1  ;;  %v1735_v14 = vld [vmem:[%s2892_s8] sm:$0xff] }
 0x279   :  { %v1342_v42 = vadd.f32 %v1962_v8, %v1341_v5  ;;  %v1416_v36 = vmul.f32 %v2790_v29, %v1415_v39  ;;  %v1392_v4 = vand.u32 2147483647, %v2782_v1  ;;  %vm1420_vm12 = vmor %vm1418_vm9, %vm1419_vm8  ;;  %vm1388_vm13 = vweird.f32 %v2782_v1 }
 0x27a   :  { %v1402_v31 = vadd.f32 %v1964_v19, %v1401_v22  ;;  %v1332_v55 = vand.u32 2147483647, %v2788_v27  ;;  %vm1423_vm15 = vcmp.eq.f32.partialorder %v1422_v62, 8.507059e+37  ;;  %v1395_v10 = vor.u32 1.1754944e-38, %v1394_v63 }
 0x27b   :  { %v1968_v49 = vpop.eup %1967  ;;  %v1346_v45 = vsel %vm1345_vm4, %v1962_v8, %v1342_v42  ;;  %v1417_v2 = vadd.f32 %v2790_v29, %v1416_v36  ;;  %vm1328_vm2 = vweird.f32 %v2788_v27  ;;  %vm1393_vm4 = vcmp.eq.f32.partialorder %v1392_v4, 8.507059e+37  ;;  %v1736_v36 = vld [vmem:[%s2892_s8 + $0x8] sm:$0xff] }
 0x27c   :  { %v2811_v50 = vpop.xlane.xlu0 %1174  ;;  %v1351_v38 = vsel %vm1348_vm5, %v1350_v44, %v1346_v45  ;;  %v1406_v56 = vsel %vm1405_vm7, %v1964_v19, %v1402_v31  ;;  %v1384_v35 = vmul.f32 %v1968_v49, %v2782_v1  ;;  %v1970_v57 = vpop.eup %1969  ;;  %vm1389_vm11 = vweird.f32 %v1968_v49  ;;  %v1738_v45 = vld [vmem:[%s2892_s8 + $0x18] sm:$0xff] }
 0x27d   :  { %1971 = vrcp.f32 %v2811_v50  ;;  %v1411_v58 = vsel %vm1408_vm6, %v1410_v51, %v1406_v56  ;;  %v1352_v13 = vmul.f32 %v2663_v47, %v1351_v38  ;;  %v1324_v59 = vmul.f32 %v1970_v57, %v2788_v27  ;;  %vm1390_vm1 = vmor %vm1388_vm13, %vm1389_vm11  ;;  %v1737_v51 = vld [vmem:[%s2892_s8 + $0x10] sm:$0xff]  ;;  %1761 = vmatpush.msra.mxu0 %v1738_v45 }
 0x27e   :  { %v1385_v52 = vsub.f32 1.0, %v1384_v35  ;;  %v1412_v41 = vmul.f32 %v2668_v15, %v1411_v58  ;;  %v1334_v15 = vand.u32 2147483648, %v2788_v27  ;;  %v1421_v61 = vsel %vm1420_vm12, %v2790_v29, %v1417_v2 }
 0x27f   :  { %1882 = vmatmul.msk.f32.vlgmr.msra.gmra.mxu1 %vm1043_vm10, %v1352_v13  ;;  %v1325_v47 = vsub.f32 1.0, %v1324_v59  ;;  %vm1329_vm14 = vweird.f32 %v1970_v57  ;;  %v1426_v17 = vsel %vm1423_vm15, %v1425_v0, %v1421_v61  ;;  %vm1333_vm6 = vcmp.eq.f32.partialorder %v1332_v55, 8.507059e+37  ;;  %1762 = vmatpush.msra.mxu0 %v1737_v51 }
 0x280   :  { %v1386_v3 = vmul.f32 %v1968_v49, %v1385_v52  ;;  %1886 = vmatmul.msk.f32.vlgmr.msrb.gmra.mxu3 %vm1043_vm10, %v1412_v41  ;;  %v1335_v19 = vor.u32 1.1754944e-38, %v1334_v15  ;;  %vm1330_vm5 = vmor %vm1328_vm2, %vm1329_vm14  ;;  %v1364_v21 = vand.u32 2147483648, %v2811_v50  ;;  %v1427_v25 = vmul.f32 %v2666_v48, %v1426_v17 }
 0x281   :  { %v1326_v7 = vmul.f32 %v1970_v57, %v1325_v47  ;;  %v1362_v27 = vand.u32 2147483647, %v2811_v50  ;;  %vm1358_vm8 = vweird.f32 %v2811_v50  ;;  %1763 = vmatpush.msra.mxu0 %v1736_v36  ;;  %vm1718_vm12 = vcmask 64512  }
 0x282   :  { %v1387_v8 = vadd.f32 %v1968_v49, %v1386_v3  ;;  %v1365_v12 = vor.u32 1.1754944e-38, %v1364_v21  ;;  %vm1721_vm13 = vcmask 97280   ;;  %vm1726_vm14 = vcmask 162816  }
 0x283   :  { %v1972_v6 = vpop.eup %1971  ;;  %v1327_v16 = vadd.f32 %v1970_v57, %v1326_v7  ;;  %vm1363_vm11 = vcmp.eq.f32.partialorder %v1362_v27, 8.507059e+37  ;;  %1764 = vmatpush.msra.mxu0 %v1735_v14  ;;  %vm1729_vm15 = vcmask 195584  }
 0x284   :  { %v1354_v11 = vmul.f32 %v1972_v6, %v2811_v50  ;;  %v1391_v46 = vsel %vm1390_vm1, %v1968_v49, %v1387_v8  ;;  %vm1359_vm7 = vweird.f32 %v1972_v6  ;;  %vm1732_vm1 = vcmask 228352  }
 0x285   :  { %v1396_v9 = vsel %vm1393_vm4, %v1395_v10, %v1391_v46  ;;  %v1331_v1 = vsel %vm1330_vm5, %v1970_v57, %v1327_v16  ;;  %vm1360_vm9 = vmor %vm1358_vm8, %vm1359_vm7 }
 0x286   :  { %v1355_v18 = vsub.f32 1.0, %v1354_v11  ;;  %v1397_v23 = vmul.f32 %v2679_v40, %v1396_v9  ;;  %v1336_v24 = vsel %vm1333_vm6, %v1335_v19, %v1331_v1  ;;  %v1908_v19 = vld [vmem:[%s2893_s9] ss:$0 sm:$0xff] }
 0x287   :  { %v1337_v29 = vmul.f32 %v2676_v53, %v1336_v24 }
 0x288   :  { %v1356_v26 = vmul.f32 %v1972_v6, %v1355_v18  ;;  %1885 = vmatmul.msk.f32.gmra.mxu2 %vm1043_vm10, %v1397_v23  ;;  %1887 = vmatmul.msk.f32.gmra.mxu3 %vm1043_vm10, %v1427_v25 }
 0x289   :  { %1881 = vmatmul.msk.f32.gmra.mxu0 %vm1043_vm10, %v1337_v29 }
 0x28a   :  { %v1357_v54 = vadd.f32 %v1972_v6, %v1356_v26 }
 0x28c   :  { %v1361_v40 = vsel %vm1360_vm9, %v1972_v6, %v1357_v54 }
 0x28d   :  { %v1366_v48 = vsel %vm1363_vm11, %v1365_v12, %v1361_v40 }
 0x28e   :  { %v1367_v30 = vmul.f32 %v2685_v60, %v1366_v48 }
 0x290   :  { %1883 = vmatmul.msk.f32.gmra.mxu1 %vm1043_vm10, %v1367_v30 }
 0x2b9   :  { %v1451_v33 = vpop.f32.mrf.mxu0 }
 0x2c8   :  { %v1480_v32 = vpop.f32.mrf.mxu1 }
 0x2c9   :  { %1662 = vrot.lane.b32.xlu1 %v1480_v32, %s2001_s0 }
 0x2d6   :  { %v1509_v53 = vpop.f32.mrf.mxu2 }
 0x2d7   :  { %1670 = vrot.lane.b32.xlu2 %v1509_v53, %s2002_s2 }
 0x2d8   :  { %v1454_v34 = vpop.f32.mrf.mxu0 }
 0x2da   :  { %v1538_v20 = vpop.f32.mrf.mxu3 }
 0x2ea   :  { %v1512_v28 = vpop.f32.mrf.mxu2 }
 0x2eb   :  { %1672 = vrot.lane.b32.xlu2 %v1512_v28, %s2002_s2 }
 0x2ee   :  { %v1483_v5 = vpop.f32.mrf.mxu1 }
 0x2ef   :  { %1664 = vrot.lane.b32.xlu0 %v1483_v5, %s2001_s0 }
 0x2f3   :  { %v1541_v39 = vpop.f32.mrf.mxu3 }
 0x2f5   :  { %v1567_v22 = vpop.f32.mrf.mxu0 }
 0x2f6   :  { %1686 = vrot.lane.b32.xlu1 %v1567_v22, %s2003_s20 }
 0x2f7   :  { %1678 = vrot.lane.b32.xlu0 %v1538_v20, %s2004_s21 }
 0x2fb   :  { %v1625_v60 = vpop.f32.mrf.mxu2 }
 0x2fc   :  { %1702 = vrot.lane.b32.xlu2 %v1625_v60, %s2005_s22  ;;  %v1596_v37 = vpop.f32.mrf.mxu1 }
 0x2fe   :  { %1680 = vrot.lane.b32.xlu1 %v1541_v39, %s2004_s21 }
 0x2ff   :  { %1694 = vrot.lane.b32.xlu0 %v1596_v37, %s2006_s23 }
 0x303   :  { %v1654_v42 = vpop.f32.mrf.mxu3 }
 0x306   :  { %1710 = vrot.lane.b32.xlu1 %v1654_v42, %s2007_s24  ;;  %v1570_v43 = vpop.f32.mrf.mxu0 }
 0x307   :  { %1688 = vrot.lane.b32.xlu0 %v1570_v43, %s2003_s20 }
 0x30b   :  { %v1628_v31 = vpop.f32.mrf.mxu2  ;;  %v1657_v49 = vpop.f32.mrf.mxu3 }
 0x30d   :  { %v1599_v44 = vpop.f32.mrf.mxu1 }
 0x30e   :  { %1696 = vrot.lane.b32.xlu2 %v1599_v44, %s2006_s23  ;;  %1704 = vrot.lane.b32.xlu1 %v1628_v31, %s2005_s22 }
 0x30f   :  { %1712 = vrot.lane.b32.xlu0 %v1657_v49, %s2007_s24 }
 0x331   :  { %v1671_v56 = vpop.permute.xlu2 %1670 }
 0x33b   :  { %v1663_v50 = vpop.permute.xlu1 %1662 }
 0x33c   :  { %v1716_v58 = vsel %vm730_vm3, %v1451_v33, %v1663_v50 }
 0x33d   :  { %v1719_v59 = vsel %vm1718_vm12, %v1716_v58, %v1671_v56 }
 0x345   :  { %v1673_v13 = vpop.permute.xlu2 %1672 }
 0x356   :  { %v1703_v2 = vpop.permute.xlu2 %1702 }
 0x361   :  { %v1665_v38 = vpop.permute.xlu0 %1664 }
 0x362   :  { %v1717_v15 = vsel %vm730_vm3, %v1454_v34, %v1665_v38 }
 0x363   :  { %v1720_v55 = vsel %vm1718_vm12, %v1717_v15, %v1673_v13 }
 0x368   :  { %v1687_v35 = vpop.permute.xlu1 %1686  ;;  %v1697_v10 = vpop.permute.xlu2 %1696 }
 0x369   :  { %v1679_v57 = vpop.permute.xlu0 %1678 }
 0x36a   :  { %v1722_v41 = vsel %vm1721_vm13, %v1719_v59, %v1679_v57 }
 0x36b   :  { %v1724_v62 = vsel %vm1043_vm10, %v1722_v41, %v1687_v35 }
 0x370   :  { %v1681_v52 = vpop.permute.xlu1 %1680 }
 0x371   :  { %v1695_v0 = vpop.permute.xlu0 %1694  ;;  %v1723_v6 = vsel %vm1721_vm13, %v1720_v55, %v1681_v52 }
 0x372   :  { %v1727_v63 = vsel %vm1726_vm14, %v1724_v62, %v1695_v0 }
 0x373   :  { %v1730_v3 = vsel %vm1729_vm15, %v1727_v63, %v1703_v2 }
 0x378   :  { %v1711_v47 = vpop.permute.xlu1 %1710 }
 0x379   :  { %v1733_v4 = vsel %vm1732_vm1, %v1730_v3, %v1711_v47  ;;  %v1689_v61 = vpop.permute.xlu0 %1688 }
 0x37a   :  { %1888 = vmatmul.msk.f32.vlgmr.msra.gmra.mxu0 %vm107_vm0, %v1733_v4  ;;  %v1725_v7 = vsel %vm1043_vm10, %v1723_v6, %v1689_v61 }
 0x37b   :  { %v1728_v11 = vsel %vm1726_vm14, %v1725_v7, %v1697_v10 }
 0x380   :  { %v1705_v8 = vpop.permute.xlu1 %1704 }
 0x381   :  { %v1731_v17 = vsel %vm1729_vm15, %v1728_v11, %v1705_v8  ;;  %v1713_v16 = vpop.permute.xlu0 %1712 }
 0x382   :  { %v1734_v46 = vsel %vm1732_vm1, %v1731_v17, %v1713_v16 }
 0x383   :  { %1889 = vmatmul.msk.f32.gmra.mxu0 %vm107_vm0, %v1734_v46 }
 0x3f7   :  { %v1766_v18 = vpop.f32.mrf.mxu0 }
 0x3f8   :  { %v1767_v9 = vadd.f32 %v1908_v19, %v1766_v18 }
 0x3fa   :  { %1772 = vst.msk [vmem:[#allocation2] sm:$0xff] %vm107_vm0, %v1767_v9 }
 0x400   :  { %v1769_v21 = vpop.f32.mrf.mxu0 }
 0x401   :  { %v1770_v1 = vadd.f32 %v1908_v19, %v1769_v21 }
 0x403   :  { %1773 = vst.msk [vmem:[#allocation2 + $0x8] sm:$0xff] %vm107_vm0, %v1770_v1 }
 0x404   :  { %1786 = dma.vmem_to_hbm [thread:$0]  %s1779_s16, 256, %s1781_s7, [#allocation3], %s2009_s17, %s2009_s17, %s2002_s2  }
 0x405   :  { %1997 = dma.done.wait [#allocation3], 256  }
 0x406   :  { %1998 = vsyncadd [#allocation3], 4294967040 }
 0x407   :  { %1791 = vsyncpa [#allocation3], 1 }

</bundles_post_ra>
